<compile_context>
chip_gen: v7x
topology: tpu7x:2x2x1
jax: 0.10.0
libtpu: 0.0.40
codegen_flags: <defaults>
</compile_context>

<pallas_src>
import functools
import math

import jax
import jax.numpy as jnp
from jax.experimental import pallas as pl
from jax.experimental.pallas import tpu as pltpu


# ---------------------------------------------------------------------------
# Kernel
# ---------------------------------------------------------------------------
def _resblock_kernel(
    x_ref,                                    # [Bt, S, D]   f32
    ln1_g, ln1_b,                             # [1, D]       f32
    wqkv, bqkv,                               # [D, 3D] bf16, [1, 3D] f32 (q part pre-scaled)
    wo, bo,                                   # [D, D]  bf16, [1, D]  f32
    ln2_g, ln2_b,                             # [1, D]       f32
    wfc, bfc,                                 # [D, 4D] bf16, [1, 4D] f32
    wproj, bproj,                             # [4D, D] bf16, [1, D]  f32
    o_ref,                                    # [Bt, S, D]
    *, n_head,
):
    Bt, S, D = x_ref.shape
    hd = D // n_head
    BS = Bt * S
    cd = wqkv.dtype                           # compute dtype for MXU operands (bf16)

    x = x_ref[...].astype(jnp.float32).reshape(BS, D)   # flatten batch-tile rows

    def layer_norm(v, g, b):                  # f32 statistics (eps matches PyTorch)
        mu = jnp.mean(v, axis=-1, keepdims=True)
        var = jnp.mean((v - mu) ** 2, axis=-1, keepdims=True)
        return (v - mu) * jax.lax.rsqrt(var + 1e-5) * g + b

    # ---------------- attention branch ----------------
    h1 = layer_norm(x, ln1_g[0], ln1_b[0])
    qkv = jnp.dot(h1.astype(cd), wqkv[...],
                  preferred_element_type=jnp.float32) + bqkv[0]          # [BS, 3D] f32
    q = qkv[:, :D].reshape(Bt, S, D)
    k = qkv[:, D:2 * D].reshape(Bt, S, D)
    v = qkv[:, 2 * D:].reshape(Bt, S, D)

    # Static, small head loop; each head is batched over Bt.  Head recombination
    # is folded into the output projection (no concatenate, no 4-D transposes).
    attn = jnp.zeros((BS, D), jnp.float32)
    for h in range(n_head):
        lo, hi = h * hd, (h + 1) * hd
        qh = q[:, :, lo:hi].astype(cd)                                   # [Bt, S, hd]
        kh = k[:, :, lo:hi].astype(cd)
        vh = v[:, :, lo:hi].astype(cd)
        s = jnp.einsum("bqd,bkd->bqk", qh, kh,
                       preferred_element_type=jnp.float32)               # [Bt, S, S]
        s = s - jnp.max(s, axis=-1, keepdims=True)                       # f32 stability
        p = jnp.exp(s)                                                   # EUP (f32)
        p = p * pl.reciprocal(jnp.sum(p, axis=-1, keepdims=True), approx=True)
        ah = jnp.einsum("bqk,bkd->bqd", p.astype(cd), vh,
                        preferred_element_type=jnp.float32)              # [Bt, S, hd]
        attn = attn + jnp.dot(ah.reshape(BS, hd).astype(cd), wo[lo:hi, :],
                              preferred_element_type=jnp.float32)        # [BS, D]

    x1 = x + attn + bo[0]

    # ---------------- MLP branch ----------------
    h2 = layer_norm(x1, ln2_g[0], ln2_b[0])
    f = jnp.dot(h2.astype(cd), wfc[...],
                preferred_element_type=jnp.float32) + bfc[0]             # [BS, 4D] f32
    f = f * jax.nn.sigmoid(1.702 * f)                                    # QuickGELU (f32)
    m = jnp.dot(f.astype(cd), wproj[...],
                preferred_element_type=jnp.float32) + bproj[0]           # [BS, D]

    o_ref[...] = (x1 + m).reshape(Bt, S, D).astype(o_ref.dtype)


# ---------------------------------------------------------------------------
# Wrapper
# ---------------------------------------------------------------------------
def residual_attention_block(x_sbd, params, n_head, *,
                             batch_block=8, compute_dtype=jnp.bfloat16):
    """x_sbd: [seq, batch, d_model] float32.  params: dict of f32 arrays."""
    S, B, D = x_sbd.shape
    assert D % n_head == 0, "d_model must be divisible by n_head"
    hd = D // n_head

    # Batch-tile size: largest divisor of B that is <= batch_block, capped so the
    # (parallel) grid axis has extent >= 2 when B >= 2 (keeps both v7x TCs busy).
    bt_cap = max(1, min(batch_block, max(1, B // 2)))
    bt = 1
    for d in range(bt_cap, 0, -1):
        if B % d == 0:
            bt = d
            break
    grid_b = B // bt

    x = jnp.transpose(x_sbd, (1, 0, 2))       # [B, S, D]

    # Fold the 1/sqrt(hd) attention scale into the q-columns of the QKV weight/bias
    # (done in f32, before the bf16 cast).
    scale = 1.0 / math.sqrt(hd)
    wqkv = params["wqkv"].astype(jnp.float32).at[:, :D].multiply(scale)
    bqkv = params["bqkv"].astype(jnp.float32).at[:, :D].multiply(scale)

    cd = compute_dtype
    param_list = [
        params["ln1_g"], params["ln1_b"],
        wqkv.astype(cd), bqkv,
        params["wo"].astype(cd), params["bo"],
        params["ln2_g"], params["ln2_b"],
        params["wfc"].astype(cd), params["bfc"],
        params["wproj"].astype(cd), params["bproj"],
    ]

    def const_spec(shape):                    # whole-array block, constant index_map
        nd = len(shape)
        return pl.BlockSpec(shape, lambda b, _nd=nd: (0,) * _nd)

    in_specs = [pl.BlockSpec((bt, S, D), lambda b: (b, 0, 0))]
    in_specs += [const_spec(p.shape) for p in param_list]

    # VMEM budget: weights (double-buffered by the pipeline) + activations + headroom.
    weight_bytes = sum(int(p.size) * p.dtype.itemsize for p in param_list)
    act_bytes = bt * S * (16 * D + 2 * S) * 4
    io_bytes = 4 * (bt * S * D * 4)           # in + out blocks, double-buffered
    vmem_limit = 2 * weight_bytes + 3 * act_bytes + io_bytes + (4 << 20)
    vmem_limit = int(min(max(vmem_limit, 32 << 20), 96 << 20))

    out = pl.pallas_call(
        functools.partial(_resblock_kernel, n_head=n_head),
        out_shape=jax.ShapeDtypeStruct((B, S, D), x.dtype),
        grid=(grid_b,),
        in_specs=in_specs,
        out_specs=pl.BlockSpec((bt, S, D), lambda b: (b, 0, 0)),
        compiler_params=pltpu.CompilerParams(
            dimension_semantics=("parallel",),
            vmem_limit_bytes=vmem_limit,
        ),
    )(x, *param_list)

    return jnp.transpose(out, (1, 0, 2))      # back to [S, B, D]


# ---------------------------------------------------------------------------
# Pure-JAX f32 reference (same math) for a sanity check
# ---------------------------------------------------------------------------
def _reference(x_sbd, p, n_head):
    S, B, D = x_sbd.shape
    hd = D // n_head
    scale = 1.0 / math.sqrt(hd)

    def ln(v, g, b):
        mu = jnp.mean(v, -1, keepdims=True)
        var = jnp.mean((v - mu) ** 2, -1, keepdims=True)
        return (v - mu) * jax.lax.rsqrt(var + 1e-5) * g + b

    def per_batch(xb):                        # [S, D]
        h1 = ln(xb, p["ln1_g"][0], p["ln1_b"][0])
        qkv = h1 @ p["wqkv"] + p["bqkv"][0]
        q, k, v = qkv[:, :D], qkv[:, D:2 * D], qkv[:, 2 * D:]
        outs = []
        for h in range(n_head):
            qh = q[:, h * hd:(h + 1) * hd] * scale
            kh = k[:, h * hd:(h + 1) * hd]
            vh = v[:, h * hd:(h + 1) * hd]
            a = jax.nn.softmax(qh @ kh.T, axis=-1)
            outs.append(a @ vh)
        attn = jnp.concatenate(outs, -1) @ p["wo"] + p["bo"][0]
        x1 = xb + attn
        h2 = ln(x1, p["ln2_g"][0], p["ln2_b"][0])
        f = h2 @ p["wfc"] + p["bfc"][0]
        f = f * jax.nn.sigmoid(1.702 * f)
        return x1 + (f @ p["wproj"] + p["bproj"][0])

    xb = jnp.transpose(x_sbd, (1, 0, 2))
    out = jax.vmap(per_batch)(xb)
    return jnp.transpose(out, (1, 0, 2))


# ---------------------------------------------------------------------------
# Deterministic parameter construction + run
# ---------------------------------------------------------------------------
def make_params(key, d_model):
    D = d_model
    ks = jax.random.split(key, 4)
    std = 0.02
    # PyTorch Linear stores weight as [out, in]; we pre-transpose to [in, out].
    wqkv = (jax.random.normal(ks[0], (3 * D, D), jnp.float32) * std).T
    wo = (jax.random.normal(ks[1], (D, D), jnp.float32) * std).T
    wfc = (jax.random.normal(ks[2], (4 * D, D), jnp.float32) * std).T
    wproj = (jax.random.normal(ks[3], (D, 4 * D), jnp.float32) * std).T
    return {
        "ln1_g": jnp.ones((1, D), jnp.float32),
        "ln1_b": jnp.zeros((1, D), jnp.float32),
        "wqkv": wqkv, "bqkv": jnp.zeros((1, 3 * D), jnp.float32),
        "wo": wo, "bo": jnp.zeros((1, D), jnp.float32),
        "ln2_g": jnp.ones((1, D), jnp.float32),
        "ln2_b": jnp.zeros((1, D), jnp.float32),
        "wfc": wfc, "bfc": jnp.zeros((1, 4 * D), jnp.float32),
        "wproj": wproj, "bproj": jnp.zeros((1, D), jnp.float32),
    }


if __name__ == "__main__":
    # Small but TPU-friendly shapes: S multiple of 8, D multiple of 128.
    S, B, D, H = 8, 4, 128, 4                 # seq, batch, d_model, n_head
    key = jax.random.PRNGKey(0)
    kx, kp = jax.random.split(key)
    x = jax.random.normal(kx, (S, B, D), jnp.float32)   # [seq, batch, d_model]
    params = make_params(kp, D)

    out = residual_attention_block(x, params, n_head=H)
    out = jax.block_until_ready(out)

    ref = _reference(x, params, H)
    assert out.shape == (S, B, D)
    err = float(jnp.max(jnp.abs(out - ref)))
    assert err < 1e-2, f"mismatch vs pure-JAX reference: {err}"

    print("KERNEL_OK")
</pallas_src>

<mosaic_0001>
module attributes {stable_mosaic.version = 11 : i64} {
  func.func @_resblock_kernel(%arg0: i32, %arg1: memref<2x8x128xf32, #tpu.memory_space<vmem>>, %arg2: memref<1x128xf32, #tpu.memory_space<vmem>>, %arg3: memref<1x128xf32, #tpu.memory_space<vmem>>, %arg4: memref<128x384xbf16, #tpu.memory_space<vmem>>, %arg5: memref<1x384xf32, #tpu.memory_space<vmem>>, %arg6: memref<128x128xbf16, #tpu.memory_space<vmem>>, %arg7: memref<1x128xf32, #tpu.memory_space<vmem>>, %arg8: memref<1x128xf32, #tpu.memory_space<vmem>>, %arg9: memref<1x128xf32, #tpu.memory_space<vmem>>, %arg10: memref<128x512xbf16, #tpu.memory_space<vmem>>, %arg11: memref<1x512xf32, #tpu.memory_space<vmem>>, %arg12: memref<512x128xbf16, #tpu.memory_space<vmem>>, %arg13: memref<1x128xf32, #tpu.memory_space<vmem>>, %arg14: memref<2x8x128xf32, #tpu.memory_space<vmem>>) attributes {dimension_semantics = [#tpu.dimension_semantics<parallel>], iteration_bounds = array<i64: 2>, scalar_prefetch = 0 : i64, scratch_operands = 0 : i64, tpu.core_type = #tpu.core_type<tc>, window_params = [{transform_indices = @transform_0, window_bounds = array<i64: 2, 8, 128>}, {pipeline_mode = #tpu.pipeline_mode<synchronous>, transform_indices = @transform_1, window_bounds = array<i64: 1, 128>}, {pipeline_mode = #tpu.pipeline_mode<synchronous>, transform_indices = @transform_2, window_bounds = array<i64: 1, 128>}, {pipeline_mode = #tpu.pipeline_mode<synchronous>, transform_indices = @transform_3, window_bounds = array<i64: 128, 384>}, {pipeline_mode = #tpu.pipeline_mode<synchronous>, transform_indices = @transform_4, window_bounds = array<i64: 1, 384>}, {pipeline_mode = #tpu.pipeline_mode<synchronous>, transform_indices = @transform_5, window_bounds = array<i64: 128, 128>}, {pipeline_mode = #tpu.pipeline_mode<synchronous>, transform_indices = @transform_6, window_bounds = array<i64: 1, 128>}, {pipeline_mode = #tpu.pipeline_mode<synchronous>, transform_indices = @transform_7, window_bounds = array<i64: 1, 128>}, {pipeline_mode = #tpu.pipeline_mode<synchronous>, transform_indices = @transform_8, window_bounds = array<i64: 1, 128>}, {pipeline_mode = #tpu.pipeline_mode<synchronous>, transform_indices = @transform_9, window_bounds = array<i64: 128, 512>}, {pipeline_mode = #tpu.pipeline_mode<synchronous>, transform_indices = @transform_10, window_bounds = array<i64: 1, 512>}, {pipeline_mode = #tpu.pipeline_mode<synchronous>, transform_indices = @transform_11, window_bounds = array<i64: 512, 128>}, {pipeline_mode = #tpu.pipeline_mode<synchronous>, transform_indices = @transform_12, window_bounds = array<i64: 1, 128>}, {transform_indices = @transform_13, window_bounds = array<i64: 2, 8, 128>}]} {
    %c0 = arith.constant 0 : index
    %c0_0 = arith.constant 0 : index
    %c0_1 = arith.constant 0 : index
    %0 = vector.load %arg1[%c0, %c0_0, %c0_1] : memref<2x8x128xf32, #tpu.memory_space<vmem>>, vector<2x8x128xf32>
    %1 = vector.shape_cast %0 : vector<2x8x128xf32> to vector<16x128xf32>
    %c0_2 = arith.constant 0 : index
    %c0_3 = arith.constant 0 : index
    %2 = vector.load %arg2[%c0_2, %c0_3] : memref<1x128xf32, #tpu.memory_space<vmem>>, vector<1x128xf32>
    %3 = vector.shape_cast %2 : vector<1x128xf32> to vector<128xf32>
    %c0_4 = arith.constant 0 : index
    %c0_5 = arith.constant 0 : index
    %4 = vector.load %arg3[%c0_4, %c0_5] : memref<1x128xf32, #tpu.memory_space<vmem>>, vector<1x128xf32>
    %5 = vector.shape_cast %4 : vector<1x128xf32> to vector<128xf32>
    %cst = arith.constant dense<0.000000e+00> : vector<16xf32>
    %6 = vector.multi_reduction <add>, %1, %cst [1] : vector<16x128xf32> to vector<16xf32>
    %7 = vector.shape_cast %6 : vector<16xf32> to vector<16x1xf32>
    %cst_6 = arith.constant 1.280000e+02 : f32
    %8 = vector.broadcast %cst_6 : f32 to vector<16x1xf32>
    %9 = arith.divf %7, %8 : vector<16x1xf32>
    %10 = vector.broadcast %9 : vector<16x1xf32> to vector<16x128xf32>
    %11 = arith.subf %1, %10 : vector<16x128xf32>
    %12 = arith.mulf %11, %11 : vector<16x128xf32>
    %cst_7 = arith.constant dense<0.000000e+00> : vector<16xf32>
    %13 = vector.multi_reduction <add>, %12, %cst_7 [1] : vector<16x128xf32> to vector<16xf32>
    %14 = vector.shape_cast %13 : vector<16xf32> to vector<16x1xf32>
    %cst_8 = arith.constant 1.280000e+02 : f32
    %15 = vector.broadcast %cst_8 : f32 to vector<16x1xf32>
    %16 = arith.divf %14, %15 : vector<16x1xf32>
    %17 = vector.broadcast %9 : vector<16x1xf32> to vector<16x128xf32>
    %18 = arith.subf %1, %17 : vector<16x128xf32>
    %cst_9 = arith.constant 9.99999974E-6 : f32
    %19 = vector.broadcast %cst_9 : f32 to vector<16x1xf32>
    %20 = arith.addf %16, %19 : vector<16x1xf32>
    %21 = math.rsqrt %20 : vector<16x1xf32>
    %22 = vector.broadcast %21 : vector<16x1xf32> to vector<16x128xf32>
    %23 = arith.mulf %18, %22 : vector<16x128xf32>
    %24 = vector.shape_cast %3 : vector<128xf32> to vector<1x128xf32>
    %25 = vector.broadcast %24 : vector<1x128xf32> to vector<16x128xf32>
    %26 = arith.mulf %23, %25 : vector<16x128xf32>
    %27 = vector.shape_cast %5 : vector<128xf32> to vector<1x128xf32>
    %28 = vector.broadcast %27 : vector<1x128xf32> to vector<16x128xf32>
    %29 = arith.addf %26, %28 : vector<16x128xf32>
    %30 = arith.truncf %29 : vector<16x128xf32> to vector<16x128xbf16>
    %c0_10 = arith.constant 0 : index
    %c0_11 = arith.constant 0 : index
    %31 = vector.load %arg4[%c0_10, %c0_11] : memref<128x384xbf16, #tpu.memory_space<vmem>>, vector<128x384xbf16>
    %cst_12 = arith.constant dense<0.000000e+00> : vector<16x384xf32>
    %32 = tpu.matmul %30, %31, %cst_12 {dimension_numbers = #tpu.dot_dimension_numbers<[1], [0], [0], [1], [0, 0, 1, 1], [], []>} : vector<16x128xbf16>, vector<128x384xbf16>, vector<16x384xf32> -> vector<16x384xf32>
    %c0_13 = arith.constant 0 : index
    %c0_14 = arith.constant 0 : index
    %33 = vector.load %arg5[%c0_13, %c0_14] : memref<1x384xf32, #tpu.memory_space<vmem>>, vector<1x384xf32>
    %34 = vector.shape_cast %33 : vector<1x384xf32> to vector<384xf32>
    %35 = vector.shape_cast %34 : vector<384xf32> to vector<1x384xf32>
    %36 = vector.broadcast %35 : vector<1x384xf32> to vector<16x384xf32>
    %37 = arith.addf %32, %36 : vector<16x384xf32>
    %38 = vector.extract_strided_slice %37 {offsets = [0, 0], sizes = [16, 128], strides = [1, 1]} : vector<16x384xf32> to vector<16x128xf32>
    %39 = vector.shape_cast %38 : vector<16x128xf32> to vector<2x8x128xf32>
    %40 = vector.extract_strided_slice %37 {offsets = [0, 128], sizes = [16, 128], strides = [1, 1]} : vector<16x384xf32> to vector<16x128xf32>
    %41 = vector.shape_cast %40 : vector<16x128xf32> to vector<2x8x128xf32>
    %42 = vector.extract_strided_slice %37 {offsets = [0, 256], sizes = [16, 128], strides = [1, 1]} : vector<16x384xf32> to vector<16x128xf32>
    %43 = vector.shape_cast %42 : vector<16x128xf32> to vector<2x8x128xf32>
    %cst_15 = arith.constant 0.000000e+00 : f32
    %44 = vector.broadcast %cst_15 : f32 to vector<16x128xf32>
    %45 = vector.extract_strided_slice %39 {offsets = [0, 0, 0], sizes = [2, 8, 32], strides = [1, 1, 1]} : vector<2x8x128xf32> to vector<2x8x32xf32>
    %46 = arith.truncf %45 : vector<2x8x32xf32> to vector<2x8x32xbf16>
    %47 = vector.extract_strided_slice %41 {offsets = [0, 0, 0], sizes = [2, 8, 32], strides = [1, 1, 1]} : vector<2x8x128xf32> to vector<2x8x32xf32>
    %48 = arith.truncf %47 : vector<2x8x32xf32> to vector<2x8x32xbf16>
    %49 = vector.extract_strided_slice %43 {offsets = [0, 0, 0], sizes = [2, 8, 32], strides = [1, 1, 1]} : vector<2x8x128xf32> to vector<2x8x32xf32>
    %50 = arith.truncf %49 : vector<2x8x32xf32> to vector<2x8x32xbf16>
    "tpu.trace_start"() <{level = 10 : i32, message = "bqd,bkd->bqk"}> : () -> ()
    %cst_16 = arith.constant dense<0.000000e+00> : vector<2x8x8xf32>
    %51 = tpu.matmul %46, %48, %cst_16 {dimension_numbers = #tpu.dot_dimension_numbers<[2], [2], [1], [1], [0, 0, 0, 1, 1, 1], [0], [0]>} : vector<2x8x32xbf16>, vector<2x8x32xbf16>, vector<2x8x8xf32> -> vector<2x8x8xf32>
    "tpu.trace_stop"() : () -> ()
    %cst_17 = arith.constant dense<0xFF800000> : vector<2x8xf32>
    %52 = vector.multi_reduction <maximumf>, %51, %cst_17 [2] : vector<2x8x8xf32> to vector<2x8xf32>
    %53 = vector.shape_cast %52 : vector<2x8xf32> to vector<2x8x1xf32>
    %54 = vector.broadcast %53 : vector<2x8x1xf32> to vector<2x8x8xf32>
    %55 = arith.subf %51, %54 : vector<2x8x8xf32>
    %56 = math.exp %55 : vector<2x8x8xf32>
    %cst_18 = arith.constant dense<0.000000e+00> : vector<2x8xf32>
    %57 = vector.multi_reduction <add>, %56, %cst_18 [2] : vector<2x8x8xf32> to vector<2x8xf32>
    %58 = vector.shape_cast %57 : vector<2x8xf32> to vector<2x8x1xf32>
    %59 = tpu.reciprocal %58 {approx = true} : vector<2x8x1xf32> -> vector<2x8x1xf32>
    %60 = vector.broadcast %59 : vector<2x8x1xf32> to vector<2x8x8xf32>
    %61 = arith.mulf %56, %60 : vector<2x8x8xf32>
    %62 = arith.truncf %61 : vector<2x8x8xf32> to vector<2x8x8xbf16>
    "tpu.trace_start"() <{level = 10 : i32, message = "bqk,bkd->bqd"}> : () -> ()
    %cst_19 = arith.constant dense<0.000000e+00> : vector<2x8x32xf32>
    %63 = tpu.matmul %62, %50, %cst_19 {dimension_numbers = #tpu.dot_dimension_numbers<[2], [1], [1], [2], [0, 0, 0, 1, 1, 2], [0], [0]>} : vector<2x8x8xbf16>, vector<2x8x32xbf16>, vector<2x8x32xf32> -> vector<2x8x32xf32>
    "tpu.trace_stop"() : () -> ()
    %64 = vector.shape_cast %63 : vector<2x8x32xf32> to vector<16x32xf32>
    %65 = arith.truncf %64 : vector<16x32xf32> to vector<16x32xbf16>
    %c0_20 = arith.constant 0 : index
    %c0_21 = arith.constant 0 : index
    %66 = vector.load %arg6[%c0_20, %c0_21] : memref<128x128xbf16, #tpu.memory_space<vmem>>, vector<32x128xbf16>
    %cst_22 = arith.constant dense<0.000000e+00> : vector<16x128xf32>
    %67 = tpu.matmul %65, %66, %cst_22 {dimension_numbers = #tpu.dot_dimension_numbers<[1], [0], [0], [1], [0, 0, 1, 1], [], []>} : vector<16x32xbf16>, vector<32x128xbf16>, vector<16x128xf32> -> vector<16x128xf32>
    %68 = arith.addf %44, %67 : vector<16x128xf32>
    %69 = vector.extract_strided_slice %39 {offsets = [0, 0, 32], sizes = [2, 8, 32], strides = [1, 1, 1]} : vector<2x8x128xf32> to vector<2x8x32xf32>
    %70 = arith.truncf %69 : vector<2x8x32xf32> to vector<2x8x32xbf16>
    %71 = vector.extract_strided_slice %41 {offsets = [0, 0, 32], sizes = [2, 8, 32], strides = [1, 1, 1]} : vector<2x8x128xf32> to vector<2x8x32xf32>
    %72 = arith.truncf %71 : vector<2x8x32xf32> to vector<2x8x32xbf16>
    %73 = vector.extract_strided_slice %43 {offsets = [0, 0, 32], sizes = [2, 8, 32], strides = [1, 1, 1]} : vector<2x8x128xf32> to vector<2x8x32xf32>
    %74 = arith.truncf %73 : vector<2x8x32xf32> to vector<2x8x32xbf16>
    "tpu.trace_start"() <{level = 10 : i32, message = "bqd,bkd->bqk"}> : () -> ()
    %cst_23 = arith.constant dense<0.000000e+00> : vector<2x8x8xf32>
    %75 = tpu.matmul %70, %72, %cst_23 {dimension_numbers = #tpu.dot_dimension_numbers<[2], [2], [1], [1], [0, 0, 0, 1, 1, 1], [0], [0]>} : vector<2x8x32xbf16>, vector<2x8x32xbf16>, vector<2x8x8xf32> -> vector<2x8x8xf32>
    "tpu.trace_stop"() : () -> ()
    %cst_24 = arith.constant dense<0xFF800000> : vector<2x8xf32>
    %76 = vector.multi_reduction <maximumf>, %75, %cst_24 [2] : vector<2x8x8xf32> to vector<2x8xf32>
    %77 = vector.shape_cast %76 : vector<2x8xf32> to vector<2x8x1xf32>
    %78 = vector.broadcast %77 : vector<2x8x1xf32> to vector<2x8x8xf32>
    %79 = arith.subf %75, %78 : vector<2x8x8xf32>
    %80 = math.exp %79 : vector<2x8x8xf32>
    %cst_25 = arith.constant dense<0.000000e+00> : vector<2x8xf32>
    %81 = vector.multi_reduction <add>, %80, %cst_25 [2] : vector<2x8x8xf32> to vector<2x8xf32>
    %82 = vector.shape_cast %81 : vector<2x8xf32> to vector<2x8x1xf32>
    %83 = tpu.reciprocal %82 {approx = true} : vector<2x8x1xf32> -> vector<2x8x1xf32>
    %84 = vector.broadcast %83 : vector<2x8x1xf32> to vector<2x8x8xf32>
    %85 = arith.mulf %80, %84 : vector<2x8x8xf32>
    %86 = arith.truncf %85 : vector<2x8x8xf32> to vector<2x8x8xbf16>
    "tpu.trace_start"() <{level = 10 : i32, message = "bqk,bkd->bqd"}> : () -> ()
    %cst_26 = arith.constant dense<0.000000e+00> : vector<2x8x32xf32>
    %87 = tpu.matmul %86, %74, %cst_26 {dimension_numbers = #tpu.dot_dimension_numbers<[2], [1], [1], [2], [0, 0, 0, 1, 1, 2], [0], [0]>} : vector<2x8x8xbf16>, vector<2x8x32xbf16>, vector<2x8x32xf32> -> vector<2x8x32xf32>
    "tpu.trace_stop"() : () -> ()
    %88 = vector.shape_cast %87 : vector<2x8x32xf32> to vector<16x32xf32>
    %89 = arith.truncf %88 : vector<16x32xf32> to vector<16x32xbf16>
    %c32 = arith.constant 32 : index
    %c0_27 = arith.constant 0 : index
    %90 = vector.load %arg6[%c32, %c0_27] : memref<128x128xbf16, #tpu.memory_space<vmem>>, vector<32x128xbf16>
    %cst_28 = arith.constant dense<0.000000e+00> : vector<16x128xf32>
    %91 = tpu.matmul %89, %90, %cst_28 {dimension_numbers = #tpu.dot_dimension_numbers<[1], [0], [0], [1], [0, 0, 1, 1], [], []>} : vector<16x32xbf16>, vector<32x128xbf16>, vector<16x128xf32> -> vector<16x128xf32>
    %92 = arith.addf %68, %91 : vector<16x128xf32>
    %93 = vector.extract_strided_slice %39 {offsets = [0, 0, 64], sizes = [2, 8, 32], strides = [1, 1, 1]} : vector<2x8x128xf32> to vector<2x8x32xf32>
    %94 = arith.truncf %93 : vector<2x8x32xf32> to vector<2x8x32xbf16>
    %95 = vector.extract_strided_slice %41 {offsets = [0, 0, 64], sizes = [2, 8, 32], strides = [1, 1, 1]} : vector<2x8x128xf32> to vector<2x8x32xf32>
    %96 = arith.truncf %95 : vector<2x8x32xf32> to vector<2x8x32xbf16>
    %97 = vector.extract_strided_slice %43 {offsets = [0, 0, 64], sizes = [2, 8, 32], strides = [1, 1, 1]} : vector<2x8x128xf32> to vector<2x8x32xf32>
    %98 = arith.truncf %97 : vector<2x8x32xf32> to vector<2x8x32xbf16>
    "tpu.trace_start"() <{level = 10 : i32, message = "bqd,bkd->bqk"}> : () -> ()
    %cst_29 = arith.constant dense<0.000000e+00> : vector<2x8x8xf32>
    %99 = tpu.matmul %94, %96, %cst_29 {dimension_numbers = #tpu.dot_dimension_numbers<[2], [2], [1], [1], [0, 0, 0, 1, 1, 1], [0], [0]>} : vector<2x8x32xbf16>, vector<2x8x32xbf16>, vector<2x8x8xf32> -> vector<2x8x8xf32>
    "tpu.trace_stop"() : () -> ()
    %cst_30 = arith.constant dense<0xFF800000> : vector<2x8xf32>
    %100 = vector.multi_reduction <maximumf>, %99, %cst_30 [2] : vector<2x8x8xf32> to vector<2x8xf32>
    %101 = vector.shape_cast %100 : vector<2x8xf32> to vector<2x8x1xf32>
    %102 = vector.broadcast %101 : vector<2x8x1xf32> to vector<2x8x8xf32>
    %103 = arith.subf %99, %102 : vector<2x8x8xf32>
    %104 = math.exp %103 : vector<2x8x8xf32>
    %cst_31 = arith.constant dense<0.000000e+00> : vector<2x8xf32>
    %105 = vector.multi_reduction <add>, %104, %cst_31 [2] : vector<2x8x8xf32> to vector<2x8xf32>
    %106 = vector.shape_cast %105 : vector<2x8xf32> to vector<2x8x1xf32>
    %107 = tpu.reciprocal %106 {approx = true} : vector<2x8x1xf32> -> vector<2x8x1xf32>
    %108 = vector.broadcast %107 : vector<2x8x1xf32> to vector<2x8x8xf32>
    %109 = arith.mulf %104, %108 : vector<2x8x8xf32>
    %110 = arith.truncf %109 : vector<2x8x8xf32> to vector<2x8x8xbf16>
    "tpu.trace_start"() <{level = 10 : i32, message = "bqk,bkd->bqd"}> : () -> ()
    %cst_32 = arith.constant dense<0.000000e+00> : vector<2x8x32xf32>
    %111 = tpu.matmul %110, %98, %cst_32 {dimension_numbers = #tpu.dot_dimension_numbers<[2], [1], [1], [2], [0, 0, 0, 1, 1, 2], [0], [0]>} : vector<2x8x8xbf16>, vector<2x8x32xbf16>, vector<2x8x32xf32> -> vector<2x8x32xf32>
    "tpu.trace_stop"() : () -> ()
    %112 = vector.shape_cast %111 : vector<2x8x32xf32> to vector<16x32xf32>
    %113 = arith.truncf %112 : vector<16x32xf32> to vector<16x32xbf16>
    %c64 = arith.constant 64 : index
    %c0_33 = arith.constant 0 : index
    %114 = vector.load %arg6[%c64, %c0_33] : memref<128x128xbf16, #tpu.memory_space<vmem>>, vector<32x128xbf16>
    %cst_34 = arith.constant dense<0.000000e+00> : vector<16x128xf32>
    %115 = tpu.matmul %113, %114, %cst_34 {dimension_numbers = #tpu.dot_dimension_numbers<[1], [0], [0], [1], [0, 0, 1, 1], [], []>} : vector<16x32xbf16>, vector<32x128xbf16>, vector<16x128xf32> -> vector<16x128xf32>
    %116 = arith.addf %92, %115 : vector<16x128xf32>
    %117 = vector.extract_strided_slice %39 {offsets = [0, 0, 96], sizes = [2, 8, 32], strides = [1, 1, 1]} : vector<2x8x128xf32> to vector<2x8x32xf32>
    %118 = arith.truncf %117 : vector<2x8x32xf32> to vector<2x8x32xbf16>
    %119 = vector.extract_strided_slice %41 {offsets = [0, 0, 96], sizes = [2, 8, 32], strides = [1, 1, 1]} : vector<2x8x128xf32> to vector<2x8x32xf32>
    %120 = arith.truncf %119 : vector<2x8x32xf32> to vector<2x8x32xbf16>
    %121 = vector.extract_strided_slice %43 {offsets = [0, 0, 96], sizes = [2, 8, 32], strides = [1, 1, 1]} : vector<2x8x128xf32> to vector<2x8x32xf32>
    %122 = arith.truncf %121 : vector<2x8x32xf32> to vector<2x8x32xbf16>
    "tpu.trace_start"() <{level = 10 : i32, message = "bqd,bkd->bqk"}> : () -> ()
    %cst_35 = arith.constant dense<0.000000e+00> : vector<2x8x8xf32>
    %123 = tpu.matmul %118, %120, %cst_35 {dimension_numbers = #tpu.dot_dimension_numbers<[2], [2], [1], [1], [0, 0, 0, 1, 1, 1], [0], [0]>} : vector<2x8x32xbf16>, vector<2x8x32xbf16>, vector<2x8x8xf32> -> vector<2x8x8xf32>
    "tpu.trace_stop"() : () -> ()
    %cst_36 = arith.constant dense<0xFF800000> : vector<2x8xf32>
    %124 = vector.multi_reduction <maximumf>, %123, %cst_36 [2] : vector<2x8x8xf32> to vector<2x8xf32>
    %125 = vector.shape_cast %124 : vector<2x8xf32> to vector<2x8x1xf32>
    %126 = vector.broadcast %125 : vector<2x8x1xf32> to vector<2x8x8xf32>
    %127 = arith.subf %123, %126 : vector<2x8x8xf32>
    %128 = math.exp %127 : vector<2x8x8xf32>
    %cst_37 = arith.constant dense<0.000000e+00> : vector<2x8xf32>
    %129 = vector.multi_reduction <add>, %128, %cst_37 [2] : vector<2x8x8xf32> to vector<2x8xf32>
    %130 = vector.shape_cast %129 : vector<2x8xf32> to vector<2x8x1xf32>
    %131 = tpu.reciprocal %130 {approx = true} : vector<2x8x1xf32> -> vector<2x8x1xf32>
    %132 = vector.broadcast %131 : vector<2x8x1xf32> to vector<2x8x8xf32>
    %133 = arith.mulf %128, %132 : vector<2x8x8xf32>
    %134 = arith.truncf %133 : vector<2x8x8xf32> to vector<2x8x8xbf16>
    "tpu.trace_start"() <{level = 10 : i32, message = "bqk,bkd->bqd"}> : () -> ()
    %cst_38 = arith.constant dense<0.000000e+00> : vector<2x8x32xf32>
    %135 = tpu.matmul %134, %122, %cst_38 {dimension_numbers = #tpu.dot_dimension_numbers<[2], [1], [1], [2], [0, 0, 0, 1, 1, 2], [0], [0]>} : vector<2x8x8xbf16>, vector<2x8x32xbf16>, vector<2x8x32xf32> -> vector<2x8x32xf32>
    "tpu.trace_stop"() : () -> ()
    %136 = vector.shape_cast %135 : vector<2x8x32xf32> to vector<16x32xf32>
    %137 = arith.truncf %136 : vector<16x32xf32> to vector<16x32xbf16>
    %c96 = arith.constant 96 : index
    %c0_39 = arith.constant 0 : index
    %138 = vector.load %arg6[%c96, %c0_39] : memref<128x128xbf16, #tpu.memory_space<vmem>>, vector<32x128xbf16>
    %cst_40 = arith.constant dense<0.000000e+00> : vector<16x128xf32>
    %139 = tpu.matmul %137, %138, %cst_40 {dimension_numbers = #tpu.dot_dimension_numbers<[1], [0], [0], [1], [0, 0, 1, 1], [], []>} : vector<16x32xbf16>, vector<32x128xbf16>, vector<16x128xf32> -> vector<16x128xf32>
    %140 = arith.addf %116, %139 : vector<16x128xf32>
    %141 = arith.addf %1, %140 : vector<16x128xf32>
    %c0_41 = arith.constant 0 : index
    %c0_42 = arith.constant 0 : index
    %142 = vector.load %arg7[%c0_41, %c0_42] : memref<1x128xf32, #tpu.memory_space<vmem>>, vector<1x128xf32>
    %143 = vector.shape_cast %142 : vector<1x128xf32> to vector<128xf32>
    %144 = vector.shape_cast %143 : vector<128xf32> to vector<1x128xf32>
    %145 = vector.broadcast %144 : vector<1x128xf32> to vector<16x128xf32>
    %146 = arith.addf %141, %145 : vector<16x128xf32>
    %c0_43 = arith.constant 0 : index
    %c0_44 = arith.constant 0 : index
    %147 = vector.load %arg8[%c0_43, %c0_44] : memref<1x128xf32, #tpu.memory_space<vmem>>, vector<1x128xf32>
    %148 = vector.shape_cast %147 : vector<1x128xf32> to vector<128xf32>
    %c0_45 = arith.constant 0 : index
    %c0_46 = arith.constant 0 : index
    %149 = vector.load %arg9[%c0_45, %c0_46] : memref<1x128xf32, #tpu.memory_space<vmem>>, vector<1x128xf32>
    %150 = vector.shape_cast %149 : vector<1x128xf32> to vector<128xf32>
    %cst_47 = arith.constant dense<0.000000e+00> : vector<16xf32>
    %151 = vector.multi_reduction <add>, %146, %cst_47 [1] : vector<16x128xf32> to vector<16xf32>
    %152 = vector.shape_cast %151 : vector<16xf32> to vector<16x1xf32>
    %cst_48 = arith.constant 1.280000e+02 : f32
    %153 = vector.broadcast %cst_48 : f32 to vector<16x1xf32>
    %154 = arith.divf %152, %153 : vector<16x1xf32>
    %155 = vector.broadcast %154 : vector<16x1xf32> to vector<16x128xf32>
    %156 = arith.subf %146, %155 : vector<16x128xf32>
    %157 = arith.mulf %156, %156 : vector<16x128xf32>
    %cst_49 = arith.constant dense<0.000000e+00> : vector<16xf32>
    %158 = vector.multi_reduction <add>, %157, %cst_49 [1] : vector<16x128xf32> to vector<16xf32>
    %159 = vector.shape_cast %158 : vector<16xf32> to vector<16x1xf32>
    %cst_50 = arith.constant 1.280000e+02 : f32
    %160 = vector.broadcast %cst_50 : f32 to vector<16x1xf32>
    %161 = arith.divf %159, %160 : vector<16x1xf32>
    %162 = vector.broadcast %154 : vector<16x1xf32> to vector<16x128xf32>
    %163 = arith.subf %146, %162 : vector<16x128xf32>
    %cst_51 = arith.constant 9.99999974E-6 : f32
    %164 = vector.broadcast %cst_51 : f32 to vector<16x1xf32>
    %165 = arith.addf %161, %164 : vector<16x1xf32>
    %166 = math.rsqrt %165 : vector<16x1xf32>
    %167 = vector.broadcast %166 : vector<16x1xf32> to vector<16x128xf32>
    %168 = arith.mulf %163, %167 : vector<16x128xf32>
    %169 = vector.shape_cast %148 : vector<128xf32> to vector<1x128xf32>
    %170 = vector.broadcast %169 : vector<1x128xf32> to vector<16x128xf32>
    %171 = arith.mulf %168, %170 : vector<16x128xf32>
    %172 = vector.shape_cast %150 : vector<128xf32> to vector<1x128xf32>
    %173 = vector.broadcast %172 : vector<1x128xf32> to vector<16x128xf32>
    %174 = arith.addf %171, %173 : vector<16x128xf32>
    %175 = arith.truncf %174 : vector<16x128xf32> to vector<16x128xbf16>
    %c0_52 = arith.constant 0 : index
    %c0_53 = arith.constant 0 : index
    %176 = vector.load %arg10[%c0_52, %c0_53] : memref<128x512xbf16, #tpu.memory_space<vmem>>, vector<128x512xbf16>
    %cst_54 = arith.constant dense<0.000000e+00> : vector<16x512xf32>
    %177 = tpu.matmul %175, %176, %cst_54 {dimension_numbers = #tpu.dot_dimension_numbers<[1], [0], [0], [1], [0, 0, 1, 1], [], []>} : vector<16x128xbf16>, vector<128x512xbf16>, vector<16x512xf32> -> vector<16x512xf32>
    %c0_55 = arith.constant 0 : index
    %c0_56 = arith.constant 0 : index
    %178 = vector.load %arg11[%c0_55, %c0_56] : memref<1x512xf32, #tpu.memory_space<vmem>>, vector<1x512xf32>
    %179 = vector.shape_cast %178 : vector<1x512xf32> to vector<512xf32>
    %180 = vector.shape_cast %179 : vector<512xf32> to vector<1x512xf32>
    %181 = vector.broadcast %180 : vector<1x512xf32> to vector<16x512xf32>
    %182 = arith.addf %177, %181 : vector<16x512xf32>
    %cst_57 = arith.constant 1.702000e+00 : f32
    %183 = vector.broadcast %cst_57 : f32 to vector<16x512xf32>
    %184 = arith.mulf %183, %182 : vector<16x512xf32>
    %185 = arith.negf %184 : vector<16x512xf32>
    %186 = math.exp %185 : vector<16x512xf32>
    %cst_58 = arith.constant 1.000000e+00 : f32
    %187 = vector.broadcast %cst_58 : f32 to vector<16x512xf32>
    %188 = arith.addf %187, %186 : vector<16x512xf32>
    %189 = arith.divf %187, %188 : vector<16x512xf32>
    %190 = arith.mulf %182, %189 : vector<16x512xf32>
    %191 = arith.truncf %190 : vector<16x512xf32> to vector<16x512xbf16>
    %c0_59 = arith.constant 0 : index
    %c0_60 = arith.constant 0 : index
    %192 = vector.load %arg12[%c0_59, %c0_60] : memref<512x128xbf16, #tpu.memory_space<vmem>>, vector<512x128xbf16>
    %cst_61 = arith.constant dense<0.000000e+00> : vector<16x128xf32>
    %193 = tpu.matmul %191, %192, %cst_61 {dimension_numbers = #tpu.dot_dimension_numbers<[1], [0], [0], [1], [0, 0, 1, 1], [], []>} : vector<16x512xbf16>, vector<512x128xbf16>, vector<16x128xf32> -> vector<16x128xf32>
    %c0_62 = arith.constant 0 : index
    %c0_63 = arith.constant 0 : index
    %194 = vector.load %arg13[%c0_62, %c0_63] : memref<1x128xf32, #tpu.memory_space<vmem>>, vector<1x128xf32>
    %195 = vector.shape_cast %194 : vector<1x128xf32> to vector<128xf32>
    %196 = vector.shape_cast %195 : vector<128xf32> to vector<1x128xf32>
    %197 = vector.broadcast %196 : vector<1x128xf32> to vector<16x128xf32>
    %198 = arith.addf %193, %197 : vector<16x128xf32>
    %199 = arith.addf %146, %198 : vector<16x128xf32>
    %200 = vector.shape_cast %199 : vector<16x128xf32> to vector<2x8x128xf32>
    %c0_64 = arith.constant 0 : index
    %c0_65 = arith.constant 0 : index
    %c0_66 = arith.constant 0 : index
    %201 = vector.load %arg14[%c0_64, %c0_65, %c0_66] : memref<2x8x128xf32, #tpu.memory_space<vmem>>, vector<2x8x128xf32>
    tpu.vector_store %arg14[%c0_64, %c0_65, %c0_66], %200 {strides = array<i32>} : memref<2x8x128xf32, #tpu.memory_space<vmem>>, vector<2x8x128xf32>,
    return
  }
  func.func @transform_0(%arg0: i32) -> (i32, i32, i32) {
    %c0_i32 = arith.constant 0 : i32
    %c0_i32_0 = arith.constant 0 : i32
    %c0_i32_1 = arith.constant 0 : i32
    return %arg0, %c0_i32, %c0_i32_0 : i32, i32, i32
  }
  func.func @transform_1(%arg0: i32) -> (i32, i32) {
    %c0_i32 = arith.constant 0 : i32
    %c0_i32_0 = arith.constant 0 : i32
    %c0_i32_1 = arith.constant 0 : i32
    return %c0_i32, %c0_i32_0 : i32, i32
  }
  func.func @transform_2(%arg0: i32) -> (i32, i32) {
    %c0_i32 = arith.constant 0 : i32
    %c0_i32_0 = arith.constant 0 : i32
    %c0_i32_1 = arith.constant 0 : i32
    return %c0_i32, %c0_i32_0 : i32, i32
  }
  func.func @transform_3(%arg0: i32) -> (i32, i32) {
    %c0_i32 = arith.constant 0 : i32
    %c0_i32_0 = arith.constant 0 : i32
    %c0_i32_1 = arith.constant 0 : i32
    return %c0_i32, %c0_i32_0 : i32, i32
  }
  func.func @transform_4(%arg0: i32) -> (i32, i32) {
    %c0_i32 = arith.constant 0 : i32
    %c0_i32_0 = arith.constant 0 : i32
    %c0_i32_1 = arith.constant 0 : i32
    return %c0_i32, %c0_i32_0 : i32, i32
  }
  func.func @transform_5(%arg0: i32) -> (i32, i32) {
    %c0_i32 = arith.constant 0 : i32
    %c0_i32_0 = arith.constant 0 : i32
    %c0_i32_1 = arith.constant 0 : i32
    return %c0_i32, %c0_i32_0 : i32, i32
  }
  func.func @transform_6(%arg0: i32) -> (i32, i32) {
    %c0_i32 = arith.constant 0 : i32
    %c0_i32_0 = arith.constant 0 : i32
    %c0_i32_1 = arith.constant 0 : i32
    return %c0_i32, %c0_i32_0 : i32, i32
  }
  func.func @transform_7(%arg0: i32) -> (i32, i32) {
    %c0_i32 = arith.constant 0 : i32
    %c0_i32_0 = arith.constant 0 : i32
    %c0_i32_1 = arith.constant 0 : i32
    return %c0_i32, %c0_i32_0 : i32, i32
  }
  func.func @transform_8(%arg0: i32) -> (i32, i32) {
    %c0_i32 = arith.constant 0 : i32
    %c0_i32_0 = arith.constant 0 : i32
    %c0_i32_1 = arith.constant 0 : i32
    return %c0_i32, %c0_i32_0 : i32, i32
  }
  func.func @transform_9(%arg0: i32) -> (i32, i32) {
    %c0_i32 = arith.constant 0 : i32
    %c0_i32_0 = arith.constant 0 : i32
    %c0_i32_1 = arith.constant 0 : i32
    return %c0_i32, %c0_i32_0 : i32, i32
  }
  func.func @transform_10(%arg0: i32) -> (i32, i32) {
    %c0_i32 = arith.constant 0 : i32
    %c0_i32_0 = arith.constant 0 : i32
    %c0_i32_1 = arith.constant 0 : i32
    return %c0_i32, %c0_i32_0 : i32, i32
  }
  func.func @transform_11(%arg0: i32) -> (i32, i32) {
    %c0_i32 = arith.constant 0 : i32
    %c0_i32_0 = arith.constant 0 : i32
    %c0_i32_1 = arith.constant 0 : i32
    return %c0_i32, %c0_i32_0 : i32, i32
  }
  func.func @transform_12(%arg0: i32) -> (i32, i32) {
    %c0_i32 = arith.constant 0 : i32
    %c0_i32_0 = arith.constant 0 : i32
    %c0_i32_1 = arith.constant 0 : i32
    return %c0_i32, %c0_i32_0 : i32, i32
  }
  func.func @transform_13(%arg0: i32) -> (i32, i32, i32) {
    %c0_i32 = arith.constant 0 : i32
    %c0_i32_0 = arith.constant 0 : i32
    %c0_i32_1 = arith.constant 0 : i32
    return %arg0, %c0_i32, %c0_i32_0 : i32, i32, i32
  }
}

</mosaic_0001>

<bundles_post_ra>
// kernel: tpu_custom_call.1
= control target key start
LH: loop header
LB: loop body
LE: loop exit
PB: predicated region body
PF: predicated region fallthrough
CT: control target
= control target key end

     0   :  { %s4602_s0 = inlined_call_operand.hbm [shape: f32[4,8,128], index: 0, kind: input, shape index: {}]   ;;  %s4603_s1 = inlined_call_operand.hbm [shape: f32[1,128], index: 1, kind: input, shape index: {}]   ;;  %s4604_s2 = inlined_call_operand.hbm [shape: f32[1,128], index: 2, kind: input, shape index: {}]   ;;  %s4605_s3 = inlined_call_operand.hbm [shape: bf16[128,384], index: 3, kind: input, shape index: {}]   ;;  %s4606_s4 = inlined_call_operand.vmem [shape: f32[1,384], index: 4, kind: input, shape index: {}]   ;;  %s4607_s5 = inlined_call_operand.hbm [shape: bf16[128,128], index: 5, kind: input, shape index: {}]   ;;  %s4608_s6 = inlined_call_operand.vmem [shape: f32[1,128], index: 6, kind: input, shape index: {}]   ;;  %s4609_s7 = inlined_call_operand.vmem [shape: f32[1,128], index: 7, kind: input, shape index: {}]   ;;  %s4610_s8 = inlined_call_operand.vmem [shape: f32[1,128], index: 8, kind: input, shape index: {}]   ;;  %s4611_s9 = inlined_call_operand.hbm [shape: bf16[128,512], index: 9, kind: input, shape index: {}]   ;;  %s4612_s10 = inlined_call_operand.vmem [shape: f32[1,512], index: 10, kind: input, shape index: {}]   ;;  %s4613_s11 = inlined_call_operand.hbm [shape: bf16[512,128], index: 11, kind: input, shape index: {}]   ;;  %s4614_s12 = inlined_call_operand.vmem [shape: f32[1,128], index: 12, kind: input, shape index: {}]   ;;  %s4615_s13 = inlined_call_operand.hbm [shape: f32[4,8,128], index: 13, kind: output, shape index: {}]  }
   0x1   :  { %4620 = sst [smem:[#allocation20_spill]] %s4603_s1 }
   0x2   :  { %4621 = sst [smem:[#allocation21_spill]] %s4605_s3 }
   0x3   :  { %4622 = sst [smem:[#allocation22_spill]] %s4609_s7 }
   0x4   :  { %4623 = sst [smem:[#allocation23_spill]] %s4610_s8 }
   0x5   :  { %4624 = sst [smem:[#allocation24_spill]] %s4612_s10 }
   0x6   :  { %4625 = sst [smem:[#allocation25_spill]] %s4614_s12 }
   0x7   :  { %4626 = sst [smem:[#allocation26_spill]] %s4615_s13 }
   0x8   :  { %18 = vsyncpa [#allocation3], 0 }
   0x9   :  { %20 = vsyncpa [#allocation3 + $0x1], 0 }
   0xa   :  { %21 = vsyncpa [#allocation6], 0 }
   0xb   :  { %22 = vsyncpa [#allocation9], 0 }
   0xc   :  { %23 = vsyncpa [#allocation12], 0 }
   0xd   :  { %24 = vsyncpa [#allocation4], 0 }
   0xe   :  { %26 = vsyncpa [#allocation4 + $0x1], 0  ;;  %s3986_s25 = smov 0   ;;  %s3988_s26 = smov 0  }
   0xf   :  { %s3990_s27 = smov 0   ;;  %s3992_s28 = smov 0  }
  0x10 LB: > { %s3892_s29 = smov [#allocation5]   ;;  %s4007_s14 = sadd.s32 4294967295, %s3890_s28   ;;  %s3890_s28 = sphi %s3992_s28, %s4656_s28   ;;  %s3886_s27 = sphi %s3990_s27, %s4655_s27   ;;  %s3882_s26 = sphi %s3988_s26, %s4654_s26   ;;  %s3878_s25 = sphi %s3986_s25, %s4653_s25  }
  0x11   : > { %s354_s30 = sshll.u32 %s3892_s29, 4  ;;  %p2895_p0 = scmp.ge.s32.totalorder %s3890_s28, 1  ;;  %s4012_s30 = int_to_ptr.vmem [resolvable:$true] %s354_s30 }
  0x12   : > { %p4617_p1 = scmp.eq.s32.totalorder %s4007_s14, 0  ;;  %p341_p2 = scmp.lt.s32.totalorder %s3890_s28, 3 }
  0x13   : > { %s3893_s16 = smov [#allocation8]   ;;  %s3894_s19 = smov [#allocation11]  }
  0x14   : > { %p4014_p3 = pnand %p2895_p0, %p341_p2  ;;  %s375_s17 = sshll.u32 %s3893_s16, 4  ;;  %s4021_s17 = int_to_ptr.vmem [resolvable:$true] %s375_s17 }
  0x15   : > { %s413_s20 = sshll.u32 %s3894_s19, 4  ;;  %s4629_s1 = sld [smem:[#allocation20_spill]]  ;;  %s4029_s20 = int_to_ptr.vmem [resolvable:$true] %s413_s20 }
  0x16   : > { %s4627_s15 = scalar_select %p4014_p3, 1, 0 }
  0x17   : > { %p3325_p5 = pneg %p4014_p3 }
  0x19   : > { %p4025_p6 = pnand %p3325_p5, %p4617_p1 }
  0x1b   : > { %s3614_s23 = scalar_lea.hbm %s4629_s1, 16  ;;  %p4039_p8 = pneg %p4025_p6 }
  0x1c   : > { %p3615_p7 = scmp.ne.s32.totalorder %s4629_s1, %s3614_s23  ;;  %p3621_p11 = scmp.lt.u32.totalorder %s3614_s23, %s4629_s1 }
  0x1e   : > { %p3617_p9 = pnand %p4039_p8, %p3615_p7 }
  0x20   : > { %p3618_p10 = pneg %p3617_p9 }
  0x22   : > { %p3623_p12 = pnand %p3621_p11, %p3618_p10 }
  0x24   : > { %3626 = shalt.err (!%p3623_p12)
}
  0x25   : > { %s3627_s21 = scalar_lea.vmem %s4012_s30, 16  ;;  %s3634_s22 = scalar_lea.vmem %s4012_s30, 32 }
  0x26   : > { %p3628_p13 = scmp.ne.s32.totalorder %s4012_s30, %s3627_s21  ;;  %p3635_p5 = scmp.lt.s32.totalorder %s4012_s30, %s4012_s30 }
  0x27   : > { %p3636_p7 = scmp.lt.s32.totalorder %s3634_s22, %s3627_s21 }
  0x28   : > { %p3630_p0 = pnand %p3628_p13, %p4039_p8 }
  0x29   : > { %p3637_p9 = por %p3636_p7, %p3635_p5 }
  0x2a   : > { %p3631_p2 = pneg %p3630_p0 }
  0x2c   : > { %p3638_p4 = pnand %p3637_p9, %p3631_p2 }
  0x2e   : > { %3641 = shalt.err (!%p3638_p4)
}
  0x2f   : > { %3328 = dma.hbm_to_vmem [thread:$0]  (!%p4025_p6), %s4629_s1, 16, %s4012_s30, [#allocation6]  }
  0x30   : > { %s4631_s3 = sld [smem:[#allocation21_spill]] }
  0x36   : > { %s3642_s19 = scalar_lea.hbm %s4631_s3, 3072 }
  0x37   : > { %p3643_p10 = scmp.ne.s32.totalorder %s4631_s3, %s3642_s19  ;;  %p3649_p4 = scmp.lt.u32.totalorder %s3642_s19, %s4631_s3 }
  0x39   : > { %p3645_p11 = pnand %p3643_p10, %p4039_p8 }
  0x3b   : > { %p3646_p12 = pneg %p3645_p11 }
  0x3d   : > { %p3651_p13 = pnand %p3649_p4, %p3646_p12 }
  0x3f   : > { %3654 = shalt.err (!%p3651_p13)
}
  0x40   : > { %s3655_s30 = scalar_lea.vmem %s4021_s17, 3072  ;;  %p3663_p7 = scmp.lt.s32.totalorder %s4021_s17, %s4021_s17 }
  0x41   : > { %p3656_p0 = scmp.ne.s32.totalorder %s4021_s17, %s3655_s30  ;;  %p3664_p9 = scmp.lt.s32.totalorder %s3655_s30, %s3655_s30 }
  0x43   : > { %p3658_p2 = pnand %p3656_p0, %p4039_p8  ;;  %p3665_p10 = por %p3664_p9, %p3663_p7 }
  0x45   : > { %p3659_p5 = pneg %p3658_p2 }
  0x47   : > { %p3666_p11 = pnand %p3665_p10, %p3659_p5 }
  0x49   : > { %3669 = shalt.err (!%p3666_p11)
}
  0x4a   : > { %s3895_s10 = smov 192   ;;  %s3896_s12 = smov 12  }
  0x4b   : > { %3334 = dma.hbm_to_vmem [thread:$0]  (!%p4025_p6), %s4631_s3, 3072, %s4021_s17, [#allocation9], %s3895_s10, %s3895_s10, %s3896_s12  }
  0x4c   : > { %s3670_s19 = scalar_lea.hbm %s4611_s9, 4096 }
  0x4d   : > { %p3671_p12 = scmp.ne.s32.totalorder %s4611_s9, %s3670_s19  ;;  %p3677_p0 = scmp.lt.u32.totalorder %s3670_s19, %s4611_s9 }
  0x4f   : > { %p3673_p4 = pnand %p3671_p12, %p4039_p8 }
  0x51   : > { %p3674_p13 = pneg %p3673_p4 }
  0x53   : > { %p3679_p2 = pnand %p3677_p0, %p3674_p13 }
  0x55   : > { %3682 = shalt.err (!%p3679_p2)
}
  0x56   : > { %s3683_s17 = scalar_lea.vmem %s4029_s20, 4096  ;;  %p3691_p10 = scmp.lt.s32.totalorder %s4029_s20, %s4029_s20 }
  0x57   : > { %p3684_p5 = scmp.ne.s32.totalorder %s4029_s20, %s3683_s17  ;;  %p3692_p11 = scmp.lt.s32.totalorder %s3683_s17, %s3683_s17 }
  0x59   : > { %p3686_p7 = pnand %p3684_p5, %p4039_p8  ;;  %p3693_p12 = por %p3692_p11, %p3691_p10 }
  0x5b   : > { %p3687_p9 = pneg %p3686_p7 }
  0x5d   : > { %p3694_p4 = pnand %p3693_p12, %p3687_p9 }
  0x5f   : > { %3697 = shalt.err (!%p3694_p4)
}
  0x60   : > { %s3897_s10 = smov 256   ;;  %s3898_s1 = smov 16  }
  0x61   : > { %3340 = dma.hbm_to_vmem [thread:$0]  (!%p4025_p6), %s4611_s9, 4096, %s4029_s20, [#allocation12], %s3897_s10, %s3897_s10, %s3898_s1  }
  0x62   : > { %s3899_s23 = smov [#allocation7]   ;;  %s3900_s29 = smov [#allocation10]  }
  0x63   : > { %s365_s24 = sshll.u32 %s3899_s23, 4  ;;  %s391_s19 = sshll.u32 %s3900_s29, 4  ;;  %s366_s24 = int_to_ptr.vmem [resolvable:$true] %s365_s24  ;;  %s392_s19 = int_to_ptr.vmem [resolvable:$true] %s391_s19 }
  0x64   : > { %s3698_s30 = scalar_lea.hbm %s4604_s2, 16 }
  0x65   : > { %p3699_p13 = scmp.ne.s32.totalorder %s4604_s2, %s3698_s30  ;;  %p3705_p5 = scmp.lt.u32.totalorder %s3698_s30, %s4604_s2 }
  0x67   : > { %p3701_p0 = pnand %p3699_p13, %p4039_p8 }
  0x69   : > { %p3702_p2 = pneg %p3701_p0 }
  0x6b   : > { %p3707_p7 = pnand %p3705_p5, %p3702_p2 }
  0x6d   : > { %3710 = shalt.err (!%p3707_p7)
}
  0x6e   : > { %s3711_s20 = scalar_lea.vmem %s366_s24, 16  ;;  %s3718_s10 = scalar_lea.vmem %s366_s24, 32 }
  0x6f   : > { %p3712_p9 = scmp.ne.s32.totalorder %s366_s24, %s3711_s20  ;;  %p3719_p12 = scmp.lt.s32.totalorder %s366_s24, %s366_s24 }
  0x70   : > { %p3720_p4 = scmp.lt.s32.totalorder %s3718_s10, %s3711_s20 }
  0x71   : > { %p3714_p10 = pnand %p3712_p9, %p4039_p8 }
  0x72   : > { %p3721_p1 = por %p3720_p4, %p3719_p12 }
  0x73   : > { %p3715_p11 = pneg %p3714_p10 }
  0x75   : > { %p3722_p3 = pnand %p3721_p1, %p3715_p11 }
  0x77   : > { %3725 = shalt.err (!%p3722_p3)
}
  0x78   : > { %3331 = dma.hbm_to_vmem [thread:$0]  (!%p4025_p6), %s4604_s2, 16, %s366_s24, [#allocation6]  }
  0x79   : > { %s3726_s12 = scalar_lea.hbm %s4607_s5, 1024 }
  0x7a   : > { %p3727_p13 = scmp.ne.s32.totalorder %s4607_s5, %s3726_s12  ;;  %p3733_p3 = scmp.lt.u32.totalorder %s3726_s12, %s4607_s5 }
  0x7c   : > { %p3729_p0 = pnand %p3727_p13, %p4039_p8 }
  0x7e   : > { %p3730_p1 = pneg %p3729_p0 }
  0x80   : > { %p3735_p2 = pnand %p3733_p3, %p3730_p1 }
  0x82   : > { %3738 = shalt.err (!%p3735_p2)
}
  0x83   : > { %s3739_s22 = scalar_lea.vmem %s392_s19, 1024  ;;  %p3747_p10 = scmp.lt.s32.totalorder %s392_s19, %s392_s19 }
  0x84   : > { %p3740_p5 = scmp.ne.s32.totalorder %s392_s19, %s3739_s22  ;;  %p3748_p11 = scmp.lt.s32.totalorder %s3739_s22, %s3739_s22 }
  0x86   : > { %p3742_p7 = pnand %p3740_p5, %p4039_p8  ;;  %p3749_p12 = por %p3748_p11, %p3747_p10 }
  0x88   : > { %p3743_p9 = pneg %p3742_p7 }
  0x8a   : > { %p3750_p4 = pnand %p3749_p12, %p3743_p9 }
  0x8c   : > { %3753 = shalt.err (!%p3750_p4)
}
  0x8d   : > { %s3901_s24 = smov 64   ;;  %s3902_s30 = smov 4  }
  0x8e   : > { %3337 = dma.hbm_to_vmem [thread:$0]  (!%p4025_p6), %s4607_s5, 1024, %s392_s19, [#allocation9], %s3901_s24, %s3901_s24, %s3902_s30  }
  0x8f   : > { %s3903_s10 = smov [#allocation13]   ;;  %s3754_s8 = scalar_lea.hbm %s4613_s11, 4096 }
  0x90   : > { %s429_s3 = sshll.u32 %s3903_s10, 4  ;;  %p3755_p13 = scmp.ne.s32.totalorder %s4613_s11, %s3754_s8  ;;  %s430_s3 = int_to_ptr.vmem [resolvable:$true] %s429_s3 }
  0x91   : > { %p3761_p3 = scmp.lt.u32.totalorder %s3754_s8, %s4613_s11 }
  0x92   : > { %p3757_p0 = pnand %p3755_p13, %p4039_p8 }
  0x94   : > { %p3758_p1 = pneg %p3757_p0 }
  0x96   : > { %p3763_p2 = pnand %p3761_p3, %p3758_p1 }
  0x98   : > { %3766 = shalt.err (!%p3763_p2)
}
  0x99   : > { %s3767_s19 = scalar_lea.vmem %s430_s3, 4096  ;;  %p3775_p10 = scmp.lt.s32.totalorder %s430_s3, %s430_s3 }
  0x9a   : > { %p3768_p5 = scmp.ne.s32.totalorder %s430_s3, %s3767_s19  ;;  %p3776_p11 = scmp.lt.s32.totalorder %s3767_s19, %s3767_s19 }
  0x9c   : > { %p3770_p7 = pnand %p3768_p5, %p4039_p8  ;;  %p3777_p12 = por %p3776_p11, %p3775_p10 }
  0x9e   : > { %p3771_p9 = pneg %p3770_p7 }
  0xa0   : > { %p3778_p4 = pnand %p3777_p12, %p3771_p9 }
  0xa2   : > { %3781 = shalt.err (!%p3778_p4)
}
  0xa3   : > { %3343 = dma.hbm_to_vmem [thread:$0]  (!%p4025_p6), %s4613_s11, 4096, %s430_s3, [#allocation12], %s3901_s24, %s3901_s24, %s3902_s30  }
  0xa4   : > { %s2894_s16 = sadd.s32 4294967294, %s3890_s28   ;;  %s4163_s18 = sadd.s32 1, %s3890_s28  }
  0xa5   : > { %s36_s17 = ssub.s32 %s3890_s28, %s4163_s18  ;;  %s39_s20 = sadd.s32 1, %s3886_s27 }
  0xa6   : > { %p37_p8 = scmp.eq.s32.totalorder %s36_s17, 0  ;;  %p46_p13 = scmp.ne.s32.totalorder %s3886_s27, %s3882_s26 }
  0xa7   : > { %p47_p0 = scmp.eq.s32.totalorder %s3890_s28, 0  ;;  %p52_p1 = scmp.ne.s32.totalorder %s3882_s26, %s3878_s25 }
  0xa8   : > { %s4174_s10 = scalar_select %p37_p8, %s3886_s27, %s39_s20  }
  0xa9   : > { %p4176_p3 = por %p47_p0, %p46_p13  ;;  %p4633_p2 = scmp.eq.s32.totalorder %s4007_s14, 0 }
  0xaa   : > { %p328_p5 = scmp.eq.s32.totalorder %s4007_s14, 1  ;;  %p334_p7 = scmp.eq.s32.totalorder %s2894_s16, 1 }
  0xab   : > { %p4182_p6 = por %p4633_p2, %p52_p1  ;;  %p3358_p9 = scmp.lt.s32.totalorder %s3890_s28, 2 }
  0xac   : > { %s446_s30 = sand.u32 1, %s3886_s27   ;;  %p4189_p10 = por %p328_p5, %p46_p13 }
  0xad   : > { %p4193_p11 = por %p334_p7, %p52_p1  ;;  %s2903_s8 = sshll.u32 %s446_s30, 4 }
  0xae   : > { %s4635_s3 = scalar_select %p4189_p10, 1, 0 }
  0xaf   : > { %s4636_s7 = scalar_select %p4193_p11, 1, 0 }
  0xb0   : > { %s3050_s12 = sshll.u32 %s3890_s28, 8  ;;  %s450_s19 = scalar_lea.vmem [#allocation2], %s2903_s8 }
  0xb1   : > { %s4201_s29 = scalar_lea.hbm %s4602_s0, %s3050_s12  ;;  %s457_s21 = sshll.u32 %s450_s19, 4  ;;  %s4203_s21 = int_to_ptr.vmem [resolvable:$true] %s457_s21 }
  0xb2   : > { %p4207_p12 = pnand %p3358_p9, %p4176_p3  ;;  %s4211_s16 = scalar_lea.sflag [#allocation3], %s446_s30 }
  0xb3   : > { %s3782_s17 = scalar_lea.hbm %s4201_s29, 256  ;;  %s3787_s1 = scalar_lea.hbm %s4602_s0, 512 }
  0xb4   : > { %p3783_p4 = scmp.ne.s32.totalorder %s4201_s29, %s3782_s17  ;;  %p3784_p8 = pneg %p4207_p12 }
  0xb5   : > { %p3788_p1 = scmp.lt.u32.totalorder %s4201_s29, %s4602_s0  ;;  %p3789_p3 = scmp.lt.u32.totalorder %s3787_s1, %s3782_s17 }
  0xb6   : > { %p3785_p13 = pnand %p3784_p8, %p3783_p4  ;;  %p3791_p5 = scmp.lt.u32.totalorder %s3782_s17, %s4201_s29 }
  0xb7   : > { %p3790_p2 = por %p3789_p3, %p3788_p1 }
  0xb8   : > { %p3786_p0 = pneg %p3785_p13 }
  0xb9   : > { %p3792_p7 = por %p3791_p5, %p3790_p2 }
  0xbb   : > { %p3793_p9 = pnand %p3792_p7, %p3786_p0 }
  0xbd   : > { %3796 = shalt.err (!%p3793_p9)
}
  0xbe   : > { %s3797_s30 = scalar_lea.vmem %s4203_s21, 256  ;;  %s3904_s23 = smov [#allocation2]  }
  0xbf   : > { %p3798_p4 = scmp.ne.s32.totalorder %s4203_s21, %s3797_s30  ;;  %s3802_s19 = sshll.u32 %s3904_s23, 4  ;;  %s3803_s19 = int_to_ptr.vmem [resolvable:$false] %s3802_s19 }
  0xc0   : > { %s3804_s20 = scalar_lea.vmem %s3803_s19, 512  ;;  %p3805_p10 = scmp.lt.s32.totalorder %s4203_s21, %s3803_s19 }
  0xc1   : > { %p3800_p13 = pnand %p3798_p4, %p3784_p8  ;;  %p3806_p1 = scmp.lt.s32.totalorder %s3804_s20, %s3797_s30 }
  0xc3   : > { %p3801_p11 = pneg %p3800_p13  ;;  %p3807_p3 = por %p3806_p1, %p3805_p10 }
  0xc5   : > { %p3808_p2 = pnand %p3807_p3, %p3801_p11 }
  0xc7   : > { %3811 = shalt.err (!%p3808_p2)
}
  0xc8   : > { %s3905_s17 = smov 128   ;;  %s3906_s8 = smov 8  }
  0xc9   : > { %3347 = dma.hbm_to_vmem [thread:$0]  (!%p4207_p12), %s4201_s29, 256, %s4203_s21, %s4211_s16, %s3905_s17, %s3905_s17, %s3906_s8  }
  0xca   : > { %p4638_p8 = scmp.ne.s32.totalorder %s4627_s15, 0 }
  0xcb   : > { %s4242_s1 = sand.u32 (!%p4638_p8), 1, %s3882_s26  }
  0xcc   : > { %469 = sbr.rel (%p4638_p8) target bundleno = 4571 (0x11db), region = 72  ;;  %s2907_s12 = sshll.u32 (!%p4638_p8), %s4242_s1, 4 }
  0xcd   : > { %s472_s13 = scalar_lea.sflag (!%p4638_p8), [#allocation3], %s4242_s1  ;;  %s4248_s30 = scalar_lea.vmem (!%p4638_p8), [#allocation2], %s2907_s12 }
  0xd3   : > { %3857 = dma.done.wait (%p4182_p6), %s472_s13, 256  }
  0xd4   : > { %3859 = vsyncadd (%p4182_p6), %s472_s13, 4294967040  ;;  %p4639_p10 = scmp.eq.s32.totalorder %s4007_s14, 0 }
  0xd6   : > { %3861 = dma.done.wait (%p4639_p10), [#allocation6], 32   ;;  %p4640_p11 = pmov %p4639_p10 }
  0xd7   : > { %p4641_p12 = pmov %p4639_p10 }
  0xd8   : > { %3863 = vsyncadd (%p4640_p11), [#allocation6], 4294967264 }
  0xd9   : > { %3865 = dma.done.wait (%p4641_p12), [#allocation9], 4096   ;;  %p4642_p0 = pmov %p4639_p10 }
  0xdb   : > { %3867 = vsyncadd (%p4642_p0), [#allocation9], 4294963200  ;;  %p4643_p5 = pmov %p4642_p0 }
  0xdc   : > { %p4644_p7 = pmov %p4642_p0 }
  0xdd   : > { %3869 = dma.done.wait (%p4643_p5), [#allocation12], 8192  }
  0xde   : > { %3871 = vsyncadd (%p4644_p7), [#allocation12], 4294959104  ;;  %v545_v0 = vld [vmem:[%s4248_s30] sm:$0xff]  ;;  %v546_v1 = vld [vmem:[%s4248_s30 + $0x8] sm:$0xff]  ;;  %v3907_v4 = vmov 0.0   ;;  %v3908_v30 = vmov 0   ;;  %v623_v53 = vlaneseq }
  0xdf   : > { %549 = vadd.xlane.f32.xlu0 %v545_v0  ;;  %v3420_v2 = vld [vmem:[#allocation8 + $0x4] ss:$12 sps:$4 sm:$0xff]   ;;  %v3422_v3 = vld [vmem:[#allocation8] ss:$12 sps:$4 sm:$0xff]   ;;  %3149 = vmatprep.subr.bf16.mxu1 %v3907_v4  ;;  %v3423_v5 = vld [vmem:[#allocation8 + $0x8] ss:$12 sps:$4 sm:$0xff]  }
  0xe0   : > { %v3424_v6 = vld [vmem:[#allocation8 + $0x1c] ss:$12 sps:$4 sm:$0xff]   ;;  %766 = vmatprep.subr.bf16.mxu0 %v3420_v2  ;;  %3150 = vmatpush3.bf16.msra.mxu1 %v3423_v5  ;;  %v3426_v15 = vld [vmem:[#allocation8 + $0x18] ss:$12 sps:$4 sm:$0xff]   ;;  %v3427_v16 = vld [vmem:[#allocation8 + $0x20] ss:$12 sps:$4 sm:$0xff]  }
  0xe1   : > { %767 = vmatpush1.bf16.msra.mxu0 %v3422_v3  ;;  %3151 = vmatprep.subr.bf16.mxu1 %v3907_v4  ;;  %v3428_v17 = vld [vmem:[#allocation8 + $0x34] ss:$12 sps:$4 sm:$0xff]   ;;  %v3430_v18 = vld [vmem:[#allocation8 + $0x30] ss:$12 sps:$4 sm:$0xff]   ;;  %v3431_v19 = vld [vmem:[#allocation8 + $0x38] ss:$12 sps:$4 sm:$0xff]  }
  0xe2   : > { %768 = vmatprep.subr.bf16.mxu0 %v3424_v6  ;;  %v3432_v20 = vld [vmem:[#allocation8 + $0x4c] ss:$12 sps:$4 sm:$0xff]   ;;  %v3434_v21 = vld [vmem:[#allocation8 + $0x48] ss:$12 sps:$4 sm:$0xff]   ;;  %v3435_v22 = vld [vmem:[#allocation8 + $0x50] ss:$12 sps:$4 sm:$0xff]   ;;  %798 = vmatprep.mubr.bf16.mxu0 %v3908_v30 }
  0xe3   : > { %551 = vadd.xlane.f32.xlu0 %v546_v1  ;;  %v3436_v23 = vld [vmem:[#allocation8 + $0x64] ss:$12 sps:$4 sm:$0xff]   ;;  %v3438_v24 = vld [vmem:[#allocation8 + $0x60] ss:$12 sps:$4 sm:$0xff]   ;;  %v3439_v25 = vld [vmem:[#allocation8 + $0x68] ss:$12 sps:$4 sm:$0xff]  }
  0xe4   : > { %3152 = vmatpush3.bf16.msra.mxu1 %v3427_v16  ;;  %v3440_v26 = vld [vmem:[#allocation8 + $0x7c] ss:$12 sps:$4 sm:$0xff]   ;;  %v3442_v27 = vld [vmem:[#allocation8 + $0x78] ss:$12 sps:$4 sm:$0xff]   ;;  %v3443_v28 = vld [vmem:[#allocation8 + $0x80] ss:$12 sps:$4 sm:$0xff]  }
  0xe5   : > { %769 = vmatpush1.bf16.msra.mxu0 %v3426_v15  ;;  %3153 = vmatprep.subr.bf16.mxu1 %v3907_v4  ;;  %v3444_v29 = vld [vmem:[#allocation8 + $0x94] ss:$12 sps:$4 sm:$0xff]   ;;  %vm3909_vm0 = vmmov 0   ;;  %v3446_v31 = vld [vmem:[#allocation8 + $0x90] ss:$12 sps:$4 sm:$0xff]   ;;  %v4295_v54 = vshrl.u32 %v623_v53, 7 }
  0xe6   : > { %770 = vmatprep.subr.bf16.mxu0 %v3428_v17  ;;  %3165 = vmatprep.mubr.msk.bf16.mxu1 %vm3909_vm0, %v3907_v4  ;;  %v3447_v32 = vld [vmem:[#allocation8 + $0x98] ss:$12 sps:$4 sm:$0xff]   ;;  %v3450_v34 = vld [vmem:[#allocation8 + $0xa8] ss:$12 sps:$4 sm:$0xff]   ;;  %v3451_v35 = vld [vmem:[#allocation8 + $0xb0] ss:$12 sps:$4 sm:$0xff]  }
  0xe7   : > { %v3448_v33 = vld [vmem:[#allocation8 + $0xac] ss:$12 sps:$4 sm:$0xff]   ;;  %v2915_v44 = vld [vmem:[#allocation5] ss:$0 sm:$0xff]  ;;  %v2916_v48 = vld [vmem:[#allocation7] ss:$0 sm:$0xff] }
  0xe8   : > { %3154 = vmatpush3.bf16.msra.mxu1 %v3431_v19  ;;  %v629_v55 = vsub.s32 1, %v4295_v54  ;;  %v621_v56 = vld [vmem:[%s4606_s4] sm:$0x7]  ;;  %v633_v57 = vsub.s32 2, %v4295_v54  ;;  %v625_v59 = vsub.s32 0, %v4295_v54  ;;  %vm856_vm1 = vcmask 261120  }
  0xe9   : > { %771 = vmatpush1.bf16.msra.mxu0 %v3430_v18  ;;  %3155 = vmatprep.subr.bf16.mxu1 %v3907_v4  ;;  %vm977_vm2 = vcmask 1043456   ;;  %vm949_vm3 = vcmask 64512   ;;  %s3910_s29 = smov 96   ;;  %s3911_s21 = smov 64  }
  0xea   : > { %772 = vmatprep.subr.bf16.mxu0 %v3432_v20  ;;  %v630_v58 = vrot.slane %v621_v56, %v629_v55  ;;  %s3912_s22 = smov 32   ;;  %s4645_s17 = sld [smem:[#allocation22_spill]] }
  0xeb   : > { %s4648_s16 = sld [smem:[#allocation25_spill]]  ;;  %s541_s23 = scalar_lea.vmem [#allocation14], %s2907_s12 }
  0xec   : > { %3156 = vmatpush3.bf16.msra.mxu1 %v3435_v22  ;;  %s2764_s19 = sshll.u32 %s541_s23, 4  ;;  %s3051_s20 = sshll.u32 %s4007_s14, 8  ;;  %s4552_s19 = int_to_ptr.vmem [resolvable:$true] %s2764_s19 }
  0xed   : > { %773 = vmatpush1.bf16.msra.mxu0 %v3434_v21  ;;  %3157 = vmatprep.subr.bf16.mxu1 %v3907_v4  ;;  %s4649_s13 = sld [smem:[#allocation26_spill]]  ;;  %s2751_s12 = scalar_lea.sflag [#allocation4], %s4242_s1 }
  0xee   : > { %774 = vmatprep.subr.bf16.mxu0 %v3436_v23  ;;  %s3812_s15 = scalar_lea.vmem %s4552_s19, 256  ;;  %p4650_p9 = scmp.ne.s32.totalorder %s4635_s3, 0 }
  0xef   : > { %p3813_p6 = scmp.ne.s32.totalorder %s4552_s19, %s3812_s15  ;;  %s3913_s14 = smov [#allocation14]  }
  0xf0   : > { %3158 = vmatpush3.bf16.msra.mxu1 %v3439_v25  ;;  %s3816_s24 = sshll.u32 %s3913_s14, 4  ;;  %s3817_s24 = int_to_ptr.vmem [resolvable:$false] %s3816_s24 }
  0xf1   : > { %775 = vmatpush1.bf16.msra.mxu0 %v3438_v24  ;;  %3159 = vmatprep.subr.bf16.mxu1 %v3907_v4  ;;  %p3814_p4 = pnand %p3813_p6, %p4650_p9  ;;  %p3819_p1 = scmp.lt.s32.totalorder %s4552_s19, %s3817_s24 }
  0xf2   : > { %776 = vmatprep.subr.bf16.mxu0 %v3440_v26 }
  0xf3   : > { %p3815_p13 = pneg %p3814_p4 }
  0xf4   : > { %3160 = vmatpush3.bf16.msra.mxu1 %v3443_v28 }
  0xf5   : > { %777 = vmatpush1.bf16.msra.mxu0 %v3442_v27  ;;  %3161 = vmatprep.subr.bf16.mxu1 %v3907_v4 }
  0xf6   : > { %778 = vmatprep.subr.bf16.mxu0 %v3444_v29 }
  0xf8   : > { %3162 = vmatpush3.bf16.msra.mxu1 %v3447_v32 }
  0xf9   : > { %779 = vmatpush1.bf16.msra.mxu0 %v3446_v31  ;;  %3163 = vmatprep.subr.bf16.mxu1 %v3907_v4 }
  0xfa   : > { %780 = vmatprep.subr.bf16.mxu0 %v3448_v33 }
  0xfc   : > { %3164 = vmatpush3.bf16.msra.mxu1 %v3451_v35 }
  0xfd   : > { %781 = vmatpush1.bf16.msra.mxu0 %v3450_v34  ;;  %3175 = vmatprep.subr.bf16.mxu1 %v3907_v4 }
  0xfe   : > { %3169 = vmatprep.subr.bf16.mxu0 %v3907_v4 }
 0x16c   : > { %v550_v7 = vpop.xlane.xlu0 %549 }
 0x16d   : > { %v554_v8 = vmul.f32 0.0078125, %v550_v7  ;;  %v626_v7 = vrot.slane %v621_v56, %v625_v59 }
 0x16f   : > { %v4270_v9 = vsub.f32 %v545_v0, %v554_v8  ;;  %v634_v0 = vrot.slane %v621_v56, %v633_v57 }
 0x170   : > { %v552_v10 = vpop.xlane.xlu0 %551 }
 0x171   : > { %v555_v11 = vmul.f32 0.0078125, %v552_v10  ;;  %v558_v12 = vmul.f32 %v4270_v9, %v4270_v9 }
 0x173   : > { %v4274_v13 = vsub.f32 %v546_v1, %v555_v11  ;;  %560 = vadd.xlane.f32.xlu1 %v558_v12 }
 0x175   : > { %v559_v14 = vmul.f32 %v4274_v13, %v4274_v13 }
 0x177   : > { %562 = vadd.xlane.f32.xlu1 %v559_v14 }
 0x200   : > { %v561_v36 = vpop.xlane.xlu1 %560 }
 0x201   : > { %v564_v37 = vmul.f32 0.0078125, %v561_v36 }
 0x203   : > { %v566_v38 = vadd.f32 1e-05, %v564_v37 }
 0x204   : > { %v563_v39 = vpop.xlane.xlu1 %562 }
 0x205   : > { %3540 = vrsqrt.f32 %v566_v38  ;;  %v565_v40 = vmul.f32 0.0078125, %v563_v39 }
 0x207   : > { %v567_v41 = vadd.f32 1e-05, %v565_v40 }
 0x209   : > { %3542 = vrsqrt.f32 %v567_v41 }
 0x20f   : > { %v3541_v42 = vpop.eup %3540 }
 0x210   : > { %v570_v43 = vmul.f32 %v3541_v42, %v4270_v9 }
 0x212   : > { %v578_v47 = vmul.f32 %v2915_v44, %v570_v43 }
 0x213   : > { %v3543_v45 = vpop.eup %3542 }
 0x214   : > { %v571_v46 = vmul.f32 %v3543_v45, %v4274_v13  ;;  %v586_v50 = vadd.f32 %v2916_v48, %v578_v47 }
 0x216   : > { %v579_v49 = vmul.f32 %v2915_v44, %v571_v46 }
 0x218   : > { %v587_v51 = vadd.f32 %v2916_v48, %v579_v49 }
 0x21a   : > { %v588_v52 = vpack.c.bf16 %v587_v51, %v586_v50 }
 0x21c   : > { %799 = vmatmul.mubr.bf16.vlgmr.msra.gmra.mrb[0].mxu0 %v588_v52  ;;  %3166 = vmatmul.mubr.bf16.vlgmr.msra.gmra.mrb[0].mxu1 %v588_v52 }
 0x21d   : > { %3171 = vmatprep.mubr.msk.bf16.mxu0 %vm3909_vm0, %v3907_v4  ;;  %3177 = vmatprep.mubr.msk.bf16.mxu1 %vm3909_vm0, %v3907_v4 }
 0x2ef   : > { %v800_v60 = vpop.f32.mrb[0].mxu0  ;;  %v843_v61 = vpop.f32.mrb[0].mxu1 }
 0x2f0   : > { %v802_v62 = vpop.f32.mrb[1].mxu0  ;;  %v3167_v63 = vpop.f32.mrb[1].mxu1  ;;  %v844_v10 = vadd.f32 %v843_v61, %v634_v0  ;;  %v801_v13 = vadd.f32 %v800_v60, %v626_v7 }
 0x2f1   : > { %v803_v1 = vadd.f32 %v802_v62, %v630_v58  ;;  %v804_v2 = vpop.f32.mrb[2].mxu0  ;;  %v846_v3 = vpop.f32.mrb[2].mxu1 }
 0x2f2   : > { %v806_v5 = vpop.f32.mrb[3].mxu0  ;;  %v3168_v6 = vpop.f32.mrb[3].mxu1  ;;  %v847_v14 = vadd.f32 %v846_v3, %v634_v0  ;;  %v4318_v16 = vpack.c.bf16 %v844_v10, %v844_v10  ;;  %v805_v17 = vadd.f32 %v804_v2, %v626_v7  ;;  %v4321_v18 = vpack.c.bf16 %v801_v13, %v801_v13 }
 0x2f3   : > { %v4309_v8 = vpack.c.bf16 %v803_v1, %v803_v1  ;;  %v807_v9 = vadd.f32 %v806_v5, %v630_v58 }
 0x2f4   : > { %v4323_v19 = vpack.c.bf16 %v847_v14, %v847_v14  ;;  %v4325_v20 = vpack.c.bf16 %v805_v17, %v805_v17  ;;  %v979_v21 = vsel %vm977_vm2, %v4318_v16, 0 }
 0x2f5   : > { %v4311_v11 = vpack.c.bf16 %v807_v9, %v807_v9  ;;  %v861_v12 = vsel %vm856_vm1, %v4309_v8, 0 }
 0x2f6   : > { %3170 = vmatpush3.bf16.xpose.msra.mxu0 %v861_v12  ;;  %v1025_v22 = vsel %vm977_vm2, %v4323_v19, 0 }
 0x2f7   : > { %v907_v15 = vsel %vm856_vm1, %v4311_v11, 0  ;;  %3181 = vmatprep.subr.bf16.mxu0 %v3907_v4 }
 0x2f8   : > { %3176 = vmatpush3.bf16.xpose.msra.mxu1 %v907_v15 }
 0x2f9   : > { %3187 = vmatprep.subr.bf16.mxu1 %v3907_v4 }
 0x2fd   : > { %3172 = vmatmul.mubr.msk.bf16.vlgmr.msra.gmra.mrb[4].mxu0 %vm856_vm1, %v4321_v18 }
 0x2fe   : > { %3182 = vmatpush3.bf16.msra.mxu0 %v979_v21  ;;  %3183 = vmatprep.mubr.msk.bf16.mxu0 %vm3909_vm0, %v3907_v4 }
 0x2ff   : > { %3178 = vmatmul.mubr.msk.bf16.vlgmr.msra.gmra.mrb[4].mxu1 %vm856_vm1, %v4325_v20  ;;  %3193 = vmatprep.subr.bf16.mxu0 %v3907_v4 }
 0x300   : > { %3188 = vmatpush3.bf16.msra.mxu1 %v1025_v22  ;;  %3189 = vmatprep.mubr.msk.bf16.mxu1 %vm3909_vm0, %v3907_v4 }
 0x301   : > { %3199 = vmatprep.subr.bf16.mxu1 %v3907_v4 }
 0x3d0   : > { %v897_v23 = vpop.f32.mrb[4].mxu0 }
 0x3d1   : > { %v3173_v24 = vpop.f32.mrb[5].mxu0  ;;  %v950_v25 = vsel %vm949_vm3, %v897_v23, -inf }
 0x3d2   : > { %v943_v26 = vpop.f32.mrb[4].mxu1  ;;  %951 = vmax.xlane.f32.xlu0 %v950_v25  ;;  %v900_v27 = vpop.f32.mrb[6].mxu0 }
 0x3d3   : > { %v3174_v28 = vpop.f32.mrb[7].mxu0  ;;  %v3179_v29 = vpop.f32.mrb[5].mxu1  ;;  %v953_v31 = vsel %vm949_vm3, %v943_v26, -inf }
 0x3d4   : > { %954 = vmax.xlane.f32.xlu1 %v953_v31  ;;  %v946_v32 = vpop.f32.mrb[6].mxu1 }
 0x3d5   : > { %v3180_v33 = vpop.f32.mrb[7].mxu1 }
 0x3e5   : > { %1128 = vrot.lane.b32.xlu1 %v4311_v11, %s3910_s29 }
 0x45f   : > { %v952_v34 = vpop.xlane.xlu0 %951 }
 0x460   : > { %v956_v35 = vsub.f32 %v897_v23, %v952_v34 }
 0x461   : > { %v955_v36 = vpop.xlane.xlu1 %954 }
 0x462   : > { %v958_v37 = vmul.f32 1.442695, %v956_v35  ;;  %v957_v38 = vsub.f32 %v943_v26, %v955_v36 }
 0x464   : > { %3544 = vpow2.f32 %v958_v37  ;;  %v960_v39 = vmul.f32 1.442695, %v957_v38 }
 0x465   : > { %v1129_v44 = vpop.permute.xlu1 %1128 }
 0x466   : > { %3546 = vpow2.f32 %v960_v39  ;;  %v1134_v58 = vsel %vm856_vm1, %v1129_v44, 0 }
 0x46e   : > { %v3545_v40 = vpop.eup %3544 }
 0x46f   : > { %v962_v41 = vsel %vm949_vm3, %v3545_v40, 0.0 }
 0x470   : > { %v3547_v42 = vpop.eup %3546  ;;  %963 = vadd.xlane.f32.xlu0 %v962_v41 }
 0x471   : > { %v965_v43 = vsel %vm949_vm3, %v3547_v42, 0.0 }
 0x472   : > { %966 = vadd.xlane.f32.xlu1 %v965_v43  ;;  %v3454_v43 = vld [vmem:[#allocation10 + $0x10] sm:$0xff]  }
 0x483   : > { %1073 = vrot.lane.b32.xlu1 %v4321_v18, %s3910_s29 }
 0x486   : > { %1076 = vrot.lane.b32.xlu0 %v4309_v8, %s3910_s29 }
 0x487   : > { %1125 = vrot.lane.b32.xlu1 %v4325_v20, %s3910_s29 }
 0x4fd   : > { %v964_v45 = vpop.xlane.xlu0 %963 }
 0x4fe   : > { %3548 = vrcp.f32 %v964_v45 }
 0x4ff   : > { %v967_v46 = vpop.xlane.xlu1 %966 }
 0x500   : > { %3550 = vrcp.f32 %v967_v46 }
 0x501   : > { %v1077_v50 = vpop.permute.xlu0 %1076 }
 0x502   : > { %v1082_v53 = vsel %vm856_vm1, %v1077_v50, 0  ;;  %v3453_v50 = vld [vmem:[#allocation10 + $0x8] sm:$0xff]  }
 0x503   : > { %v1074_v60 = vpop.permute.xlu1 %1073 }
 0x507   : > { %v1126_v61 = vpop.permute.xlu1 %1125 }
 0x508   : > { %v3549_v47 = vpop.eup %3548 }
 0x509   : > { %v970_v48 = vmul.f32 %v3549_v47, %v3545_v40  ;;  %v3452_v47 = vld [vmem:[#allocation10] sm:$0xff]  }
 0x50a   : > { %v3551_v49 = vpop.eup %3550 }
 0x50b   : > { %v971_v51 = vmul.f32 %v3551_v49, %v3547_v42  ;;  %v972_v52 = vpack.c.bf16 %v970_v48, %v970_v48  ;;  %v3455_v49 = vld [vmem:[#allocation10 + $0x18] sm:$0xff]  }
 0x50d   : > { %3184 = vmatmul.mubr.msk.bf16.vlgmr.msra.gmra.mrb[8].mxu0 %vm949_vm3, %v972_v52  ;;  %v973_v56 = vpack.c.bf16 %v971_v51, %v971_v51 }
 0x50e   : > { %3194 = vmatpush3.bf16.xpose.msra.mxu0 %v1082_v53  ;;  %3195 = vmatprep.mubr.msk.bf16.mxu0 %vm3909_vm0, %v3907_v4 }
 0x50f   : > { %3190 = vmatmul.mubr.msk.bf16.vlgmr.msra.gmra.mrb[8].mxu1 %vm949_vm3, %v973_v56  ;;  %3205 = vmatprep.subr.bf16.mxu0 %v3907_v4 }
 0x510   : > { %3200 = vmatpush3.bf16.xpose.msra.mxu1 %v1134_v58  ;;  %3201 = vmatprep.mubr.msk.bf16.mxu1 %vm3909_vm0, %v3907_v4 }
 0x511   : > { %3211 = vmatprep.subr.bf16.mxu1 %v3907_v4 }
 0x515   : > { %3196 = vmatmul.mubr.msk.bf16.vlgmr.msra.gmra.mrb[12].mxu0 %vm856_vm1, %v1074_v60 }
 0x516   : > { %3207 = vmatprep.mubr.msk.bf16.mxu0 %vm3909_vm0, %v3907_v4 }
 0x517   : > { %3202 = vmatmul.mubr.msk.bf16.vlgmr.msra.gmra.mrb[12].mxu1 %vm856_vm1, %v1126_v61 }
 0x518   : > { %3213 = vmatprep.mubr.msk.bf16.mxu1 %vm3909_vm0, %v3907_v4 }
 0x5e0   : > { %v4369_v62 = vpop.f32.mrb[8].mxu0 }
 0x5e1   : > { %v3185_v63 = vpop.f32.mrb[9].mxu0 }
 0x5e2   : > { %v1018_v0 = vpop.f32.mrb[10].mxu0  ;;  %v4371_v1 = vpop.f32.mrb[8].mxu1 }
 0x5e3   : > { %v1067_v2 = vpack.c.bf16 %v4371_v1, %v4369_v62  ;;  %v3186_v3 = vpop.f32.mrb[11].mxu0  ;;  %v3191_v5 = vpop.f32.mrb[9].mxu1 }
 0x5e4   : > { %v1064_v6 = vpop.f32.mrb[10].mxu1 }
 0x5e5   : > { %v3192_v7 = vpop.f32.mrb[11].mxu1 }
 0x5e8   : > { %v1118_v9 = vpop.f32.mrb[12].mxu0 }
 0x5e9   : > { %v3197_v10 = vpop.f32.mrb[13].mxu0  ;;  %v1176_v12 = vsel %vm949_vm3, %v1118_v9, -inf }
 0x5ea   : > { %v1170_v13 = vpop.f32.mrb[12].mxu1  ;;  %1177 = vmax.xlane.f32.xlu0 %v1176_v12  ;;  %v1121_v14 = vpop.f32.mrb[14].mxu0 }
 0x5eb   : > { %v3198_v15 = vpop.f32.mrb[15].mxu0  ;;  %v3203_v17 = vpop.f32.mrb[13].mxu1  ;;  %v1179_v21 = vsel %vm949_vm3, %v1170_v13, -inf }
 0x5ec   : > { %1180 = vmax.xlane.f32.xlu1 %v1179_v21  ;;  %v1173_v22 = vpop.f32.mrb[14].mxu1 }
 0x5ed   : > { %v3204_v23 = vpop.f32.mrb[15].mxu1 }
 0x5fd   : > { %1250 = vrot.lane.b32.xlu1 %v4323_v19, %s3910_s29 }
 0x601   : > { %1417 = vrot.lane.b32.xlu1 %v4309_v8, %s3911_s21 }
 0x605   : > { %1467 = vrot.lane.b32.xlu1 %v4311_v11, %s3911_s21 }
 0x609   : > { %1465 = vrot.lane.b32.xlu1 %v4325_v20, %s3911_s21 }
 0x677   : > { %v1178_v24 = vpop.xlane.xlu0 %1177 }
 0x678   : > { %v1182_v25 = vsub.f32 %v1118_v9, %v1178_v24 }
 0x679   : > { %v1181_v26 = vpop.xlane.xlu1 %1180 }
 0x67a   : > { %v1184_v27 = vmul.f32 1.442695, %v1182_v25  ;;  %v1183_v28 = vsub.f32 %v1170_v13, %v1181_v26 }
 0x67c   : > { %3552 = vpow2.f32 %v1184_v27  ;;  %v1186_v29 = vmul.f32 1.442695, %v1183_v28 }
 0x67d   : > { %v1251_v31 = vpop.permute.xlu1 %1250 }
 0x67e   : > { %3554 = vpow2.f32 %v1186_v29  ;;  %v1256_v32 = vsel %vm977_vm2, %v1251_v31, 0 }
 0x67f   : > { %3212 = vmatpush3.bf16.msra.mxu1 %v1256_v32 }
 0x680   : > { %3225 = vmatprep.subr.bf16.mxu1 %v3907_v4 }
 0x681   : > { %v1418_v51 = vpop.permute.xlu1 %1417 }
 0x682   : > { %v1423_v3 = vsel %vm856_vm1, %v1418_v51, 0 }
 0x685   : > { %v1468_v52 = vpop.permute.xlu1 %1467 }
 0x686   : > { %v3553_v33 = vpop.eup %3552  ;;  %v1473_v53 = vsel %vm856_vm1, %v1468_v52, 0 }
 0x687   : > { %v1188_v34 = vsel %vm949_vm3, %v3553_v33, 0.0 }
 0x688   : > { %v3555_v35 = vpop.eup %3554  ;;  %1189 = vadd.xlane.f32.xlu0 %v1188_v34 }
 0x689   : > { %v1191_v36 = vsel %vm949_vm3, %v3555_v35, 0.0  ;;  %v1466_v56 = vpop.permute.xlu1 %1465 }
 0x68c   : > { %1192 = vadd.xlane.f32.xlu0 %v1191_v36 }
 0x6a2   : > { %1201 = vrot.lane.b32.xlu0 %v4318_v16, %s3910_s29  ;;  %s4647_s29 = sld [smem:[#allocation24_spill]] }
 0x6a6   : > { %1415 = vrot.lane.b32.xlu0 %v4321_v18, %s3911_s21 }
 0x715   : > { %v1190_v37 = vpop.xlane.xlu0 %1189 }
 0x716   : > { %3556 = vrcp.f32 %v1190_v37 }
 0x719   : > { %v1193_v38 = vpop.xlane.xlu0 %1192 }
 0x71a   : > { %3558 = vrcp.f32 %v1193_v38 }
 0x71d   : > { %v1202_v39 = vpop.permute.xlu0 %1201 }
 0x71e   : > { %v1207_v40 = vsel %vm977_vm2, %v1202_v39, 0 }
 0x71f   : > { %3206 = vmatpush3.bf16.msra.mxu0 %v1207_v40 }
 0x720   : > { %v3557_v41 = vpop.eup %3556  ;;  %3217 = vmatprep.subr.bf16.mxu0 %v3907_v4 }
 0x721   : > { %v1196_v42 = vmul.f32 %v3557_v41, %v3553_v33  ;;  %v1416_v9 = vpop.permute.xlu0 %1415 }
 0x723   : > { %v1198_v44 = vpack.c.bf16 %v1196_v42, %v1196_v42 }
 0x724   : > { %v3559_v45 = vpop.eup %3558 }
 0x725   : > { %v1197_v46 = vmul.f32 %v3559_v45, %v3555_v35  ;;  %3208 = vmatmul.mubr.msk.bf16.vlgmr.msra.gmra.mrb[16].mxu0 %vm949_vm3, %v1198_v44 }
 0x726   : > { %3218 = vmatpush3.bf16.msra.mxu0 %v3454_v43  ;;  %3221 = vmatprep.mubr.msk.bf16.mxu0 %vm3909_vm0, %v3907_v4 }
 0x727   : > { %v1199_v48 = vpack.c.bf16 %v1197_v46, %v1197_v46  ;;  %3219 = vmatprep.subr.bf16.mxu0 %v3907_v4 }
 0x729   : > { %3214 = vmatmul.mubr.msk.bf16.vlgmr.msra.gmra.mrb[16].mxu1 %vm949_vm3, %v1199_v48 }
 0x72a   : > { %3226 = vmatpush3.bf16.msra.mxu1 %v3452_v47  ;;  %3229 = vmatprep.mubr.msk.bf16.mxu1 %vm3909_vm0, %v3907_v4 }
 0x72b   : > { %3227 = vmatprep.subr.bf16.mxu1 %v3907_v4  ;;  %3220 = vmatpush3.bf16.msra.mxu0 %v3455_v49 }
 0x72c   : > { %3233 = vmatprep.subr.bf16.mxu0 %v3907_v4 }
 0x72e   : > { %3228 = vmatpush3.bf16.msra.mxu1 %v3453_v50 }
 0x72f   : > { %3239 = vmatprep.subr.bf16.mxu1 %v3907_v4 }
 0x731   : > { %3230 = vmatmul.mubr.msk.bf16.vlgmr.msra.gmra.mrb[20].mxu1 %vm856_vm1, %v1067_v2 }
 0x732   : > { %3241 = vmatprep.mubr.msk.bf16.mxu1 %vm3909_vm0, %v3907_v4 }
 0x737   : > { %3240 = vmatpush3.bf16.xpose.msra.mxu1 %v1473_v53 }
 0x738   : > { %3251 = vmatprep.subr.bf16.mxu1 %v3907_v4 }
 0x73e   : > { %3242 = vmatmul.mubr.msk.bf16.vlgmr.msra.gmra.mrb[24].mxu1 %vm856_vm1, %v1466_v56 }
 0x73f   : > { %3253 = vmatprep.mubr.msk.bf16.mxu1 %vm3909_vm0, %v3907_v4 }
 0x7f8   : > { %v1243_v58 = vpop.f32.mrb[16].mxu0 }
 0x7f9   : > { %v3209_v60 = vpop.f32.mrb[17].mxu0 }
 0x7fa   : > { %v1246_v61 = vpop.f32.mrb[18].mxu0 }
 0x7fb   : > { %v3210_v62 = vpop.f32.mrb[19].mxu0 }
 0x7fc   : > { %v1292_v63 = vpop.f32.mrb[16].mxu1 }
 0x7fd   : > { %v1298_v0 = vpack.c.bf16 %v1292_v63, %v1243_v58  ;;  %v3215_v1 = vpop.f32.mrb[17].mxu1  ;;  %v3456_v58 = vld [vmem:[#allocation10 + $0x20] sm:$0xff]  }
 0x7fe   : > { %v1295_v2 = vpop.f32.mrb[18].mxu1 }
 0x7ff   : > { %v3216_v5 = vpop.f32.mrb[19].mxu1  ;;  %3222 = vmatmul.mubr.msk.bf16.vlgmr.msra.gmra.mrb[20].mxu0 %vm856_vm1, %v1298_v0  ;;  %v3457_v0 = vld [vmem:[#allocation10 + $0x28] sm:$0xff]  }
 0x800   : > { %3234 = vmatpush3.bf16.xpose.msra.mxu0 %v1423_v3  ;;  %3235 = vmatprep.mubr.msk.bf16.mxu0 %vm3909_vm0, %v3907_v4 }
 0x801   : > { %3245 = vmatprep.subr.bf16.mxu0 %v3907_v4 }
 0x804   : > { %v1408_v6 = vpop.f32.mrb[20].mxu1 }
 0x805   : > { %v3231_v7 = vpop.f32.mrb[21].mxu1 }
 0x806   : > { %v1411_v10 = vpop.f32.mrb[22].mxu1 }
 0x807   : > { %v3232_v12 = vpop.f32.mrb[23].mxu1  ;;  %3236 = vmatmul.mubr.msk.bf16.vlgmr.msra.gmra.mrb[24].mxu0 %vm856_vm1, %v1416_v9 }
 0x808   : > { %3247 = vmatprep.mubr.msk.bf16.mxu0 %vm3909_vm0, %v3907_v4 }
 0x811   : > { %v1509_v13 = vpop.f32.mrb[24].mxu1 }
 0x812   : > { %v3243_v14 = vpop.f32.mrb[25].mxu1  ;;  %v1518_v15 = vsel %vm949_vm3, %v1509_v13, -inf }
 0x813   : > { %1519 = vmax.xlane.f32.xlu1 %v1518_v15  ;;  %v1512_v17 = vpop.f32.mrb[26].mxu1 }
 0x814   : > { %v3244_v21 = vpop.f32.mrb[27].mxu1 }
 0x824   : > { %1587 = vrot.lane.b32.xlu1 %v4323_v19, %s3911_s21 }
 0x828   : > { %1700 = vrot.lane.b32.xlu1 %v4309_v8, %s3912_s22 }
 0x82c   : > { %1750 = vrot.lane.b32.xlu1 %v4311_v11, %s3912_s22 }
 0x830   : > { %1748 = vrot.lane.b32.xlu1 %v4325_v20, %s3912_s22 }
 0x8a0   : > { %v1520_v22 = vpop.xlane.xlu1 %1519 }
 0x8a1   : > { %v1522_v25 = vsub.f32 %v1509_v13, %v1520_v22 }
 0x8a3   : > { %v1525_v26 = vmul.f32 1.442695, %v1522_v25 }
 0x8a4   : > { %v1588_v23 = vpop.permute.xlu1 %1587 }
 0x8a5   : > { %v1593_v24 = vsel %vm977_vm2, %v1588_v23, 0  ;;  %3560 = vpow2.f32 %v1525_v26 }
 0x8a6   : > { %3252 = vmatpush3.bf16.msra.mxu1 %v1593_v24 }
 0x8a7   : > { %3265 = vmatprep.subr.bf16.mxu1 %v3907_v4 }
 0x8a8   : > { %v1701_v46 = vpop.permute.xlu1 %1700 }
 0x8a9   : > { %v1706_v48 = vsel %vm856_vm1, %v1701_v46, 0 }
 0x8ac   : > { %v1751_v7 = vpop.permute.xlu1 %1750 }
 0x8ad   : > { %v1756_v14 = vsel %vm856_vm1, %v1751_v7, 0 }
 0x8af   : > { %v3561_v34 = vpop.eup %3560 }
 0x8b0   : > { %v1530_v37 = vsel %vm949_vm3, %v3561_v34, 0.0  ;;  %v1749_v17 = vpop.permute.xlu1 %1748 }
 0x8d2   : > { %v1352_v27 = vpop.f32.mrb[20].mxu0 }
 0x8d3   : > { %v4435_v28 = vadd.f32 %v1408_v6, %v1352_v27  ;;  %v3223_v8 = vpop.f32.mrb[21].mxu0 }
 0x8d4   : > { %v1355_v29 = vpop.f32.mrb[22].mxu0 }
 0x8d5   : > { %v4437_v31 = vadd.f32 %v1411_v10, %v1355_v29  ;;  %v3224_v11 = vpop.f32.mrb[23].mxu0 }
 0x8da   : > { %v1459_v32 = vpop.f32.mrb[24].mxu0 }
 0x8db   : > { %v3237_v20 = vpop.f32.mrb[25].mxu0  ;;  %v1515_v33 = vsel %vm949_vm3, %v1459_v32, -inf }
 0x8dc   : > { %1516 = vmax.xlane.f32.xlu0 %v1515_v33  ;;  %v1462_v35 = vpop.f32.mrb[26].mxu0 }
 0x8dd   : > { %v3238_v36 = vpop.f32.mrb[27].mxu0 }
 0x8e0   : > { %1531 = vadd.xlane.f32.xlu0 %v1530_v37 }
 0x969   : > { %v1517_v38 = vpop.xlane.xlu0 %1516 }
 0x96a   : > { %v1521_v39 = vsub.f32 %v1459_v32, %v1517_v38 }
 0x96c   : > { %v1523_v40 = vmul.f32 1.442695, %v1521_v39 }
 0x96d   : > { %v1532_v41 = vpop.xlane.xlu0 %1531 }
 0x96e   : > { %3562 = vpow2.f32 %v1523_v40 }
 0x96f   : > { %3564 = vrcp.f32 %v1532_v41 }
 0x978   : > { %v3563_v42 = vpop.eup %3562 }
 0x979   : > { %v3565_v43 = vpop.eup %3564  ;;  %v1527_v44 = vsel %vm949_vm3, %v3563_v42, 0.0 }
 0x97a   : > { %v1536_v45 = vmul.f32 %v3565_v43, %v3561_v34  ;;  %1528 = vadd.xlane.f32.xlu0 %v1527_v44 }
 0x97c   : > { %v1538_v47 = vpack.c.bf16 %v1536_v45, %v1536_v45 }
 0x97e   : > { %3254 = vmatmul.mubr.msk.bf16.vlgmr.msra.gmra.mrb[28].mxu1 %vm949_vm3, %v1538_v47 }
 0x97f   : > { %3266 = vmatpush3.bf16.xpose.msra.mxu1 %v1706_v48  ;;  %3267 = vmatprep.mubr.msk.bf16.mxu1 %vm3909_vm0, %v3907_v4 }
 0x980   : > { %3277 = vmatprep.subr.bf16.mxu1 %v3907_v4 }
 0x990   : > { %1539 = vrot.lane.b32.xlu0 %v4318_v16, %s3911_s21 }
 0x994   : > { %1698 = vrot.lane.b32.xlu0 %v4321_v18, %s3912_s22 }
 0xa07   : > { %v1529_v49 = vpop.xlane.xlu0 %1528 }
 0xa08   : > { %3566 = vrcp.f32 %v1529_v49 }
 0xa0b   : > { %v1540_v50 = vpop.permute.xlu0 %1539 }
 0xa0c   : > { %v1545_v51 = vsel %vm977_vm2, %v1540_v50, 0  ;;  %v3458_v50 = vld [vmem:[#allocation10 + $0x30] sm:$0xff]  }
 0xa0d   : > { %3246 = vmatpush3.bf16.msra.mxu0 %v1545_v51  ;;  %v3459_v51 = vld [vmem:[#allocation10 + $0x38] sm:$0xff]  }
 0xa0e   : > { %3257 = vmatprep.subr.bf16.mxu0 %v3907_v4 }
 0xa0f   : > { %v1699_v52 = vpop.permute.xlu0 %1698 }
 0xa10   : > { %3268 = vmatmul.mubr.msk.bf16.vlgmr.msra.gmra.mrb[32].mxu1 %vm856_vm1, %v1699_v52 }
 0xa11   : > { %3279 = vmatprep.mubr.msk.bf16.mxu1 %vm3909_vm0, %v3907_v4 }
 0xa12   : > { %v3567_v53 = vpop.eup %3566 }
 0xa13   : > { %v1535_v56 = vmul.f32 %v3567_v53, %v3563_v42 }
 0xa15   : > { %v1537_v60 = vpack.c.bf16 %v1535_v56, %v1535_v56 }
 0xa17   : > { %3248 = vmatmul.mubr.msk.bf16.vlgmr.msra.gmra.mrb[28].mxu0 %vm949_vm3, %v1537_v60 }
 0xa18   : > { %3258 = vmatpush3.bf16.msra.mxu0 %v3456_v58  ;;  %3261 = vmatprep.mubr.msk.bf16.mxu0 %vm3909_vm0, %v3907_v4 }
 0xa19   : > { %3259 = vmatprep.subr.bf16.mxu0 %v3907_v4 }
 0xa1c   : > { %3260 = vmatpush3.bf16.msra.mxu0 %v3457_v0 }
 0xa1d   : > { %3271 = vmatprep.subr.bf16.mxu0 %v3907_v4 }
 0xa51   : > { %v1629_v18 = vpop.f32.mrb[28].mxu1 }
 0xa52   : > { %v3255_v61 = vpop.f32.mrb[29].mxu1 }
 0xa53   : > { %v1632_v62 = vpop.f32.mrb[30].mxu1 }
 0xa54   : > { %v3256_v63 = vpop.f32.mrb[31].mxu1 }
 0xae3   : > { %v1742_v1 = vpop.f32.mrb[32].mxu1 }
 0xae4   : > { %v3269_v2 = vpop.f32.mrb[33].mxu1  ;;  %v1798_v3 = vsel %vm949_vm3, %v1742_v1, -inf }
 0xae5   : > { %1799 = vmax.xlane.f32.xlu0 %v1798_v3  ;;  %v1745_v5 = vpop.f32.mrb[34].mxu1  ;;  %v2969_v3 = vld [vmem:[%s4608_s6] ss:$0 sm:$0xff] }
 0xae6   : > { %v3270_v6 = vpop.f32.mrb[35].mxu1  ;;  %v3612_v5 = vld [vmem:[%s4248_s30] sm:$0xff] }
 0xaea   : > { %v1581_v9 = vpop.f32.mrb[28].mxu0 }
 0xaeb   : > { %v1635_v10 = vpack.c.bf16 %v1629_v18, %v1581_v9  ;;  %v3249_v12 = vpop.f32.mrb[29].mxu0 }
 0xaec   : > { %v1584_v13 = vpop.f32.mrb[30].mxu0 }
 0xaed   : > { %v3250_v15 = vpop.f32.mrb[31].mxu0  ;;  %3262 = vmatmul.mubr.msk.bf16.vlgmr.msra.gmra.mrb[32].mxu0 %vm856_vm1, %v1635_v10  ;;  %v3613_v10 = vld [vmem:[%s4248_s30 + $0x8] sm:$0xff]  ;;  %s4646_s30 = sld [smem:[#allocation23_spill]] }
 0xaee   : > { %3272 = vmatpush3.bf16.xpose.msra.mxu0 %v1756_v14  ;;  %3273 = vmatprep.mubr.msk.bf16.mxu0 %vm3909_vm0, %v3907_v4  ;;  %v3462_v15 = vld [vmem:[#allocation11 + $0x4] ss:$16 sps:$4 sm:$0xff]  }
 0xaef   : > { %3283 = vmatprep.subr.bf16.mxu0 %v3907_v4 }
 0xaf5   : > { %3274 = vmatmul.mubr.msk.bf16.vlgmr.msra.gmra.mrb[36].mxu0 %vm856_vm1, %v1749_v17  ;;  %v3463_v17 = vld [vmem:[#allocation11 + $0x8] ss:$16 sps:$4 sm:$0xff]  }
 0xaf6   : > { %3285 = vmatprep.mubr.msk.bf16.mxu0 %vm3909_vm0, %v3907_v4 }
 0xb72   : > { %v1800_v21 = vpop.xlane.xlu0 %1799 }
 0xb73   : > { %v1804_v22 = vsub.f32 %v1742_v1, %v1800_v21  ;;  %v3465_v21 = vld [vmem:[#allocation11 + $0xc] ss:$16 sps:$4 sm:$0xff]  }
 0xb75   : > { %v1806_v23 = vmul.f32 1.442695, %v1804_v22  ;;  %v3468_v22 = vld [vmem:[#allocation11 + $0x24] ss:$16 sps:$4 sm:$0xff]  }
 0xb77   : > { %3568 = vpow2.f32 %v1806_v23  ;;  %v3471_v23 = vld [vmem:[#allocation11 + $0x2c] ss:$16 sps:$4 sm:$0xff]  }
 0xb81   : > { %v3569_v24 = vpop.eup %3568 }
 0xb82   : > { %v1810_v25 = vsel %vm949_vm3, %v3569_v24, 0.0 }
 0xb83   : > { %1811 = vadd.xlane.f32.xlu0 %v1810_v25  ;;  %v3469_v25 = vld [vmem:[#allocation11 + $0x28] ss:$16 sps:$4 sm:$0xff]  }
 0xbc0   : > { %v1689_v26 = vpop.f32.mrb[32].mxu0 }
 0xbc1   : > { %v1696_v27 = vadd.f32 %v1689_v26, %v4435_v28  ;;  %v3263_v8 = vpop.f32.mrb[33].mxu0 }
 0xbc2   : > { %v1692_v29 = vpop.f32.mrb[34].mxu0 }
 0xbc3   : > { %v1697_v11 = vadd.f32 %v1692_v29, %v4437_v31  ;;  %v3264_v32 = vpop.f32.mrb[35].mxu0 }
 0xbc8   : > { %v1792_v20 = vpop.f32.mrb[36].mxu0 }
 0xbc9   : > { %v3275_v33 = vpop.f32.mrb[37].mxu0  ;;  %v1801_v34 = vsel %vm949_vm3, %v1792_v20, -inf }
 0xbca   : > { %1802 = vmax.xlane.f32.xlu1 %v1801_v34  ;;  %v1795_v35 = vpop.f32.mrb[38].mxu0  ;;  %v3474_v34 = vld [vmem:[#allocation11 + $0x44] ss:$16 sps:$4 sm:$0xff]  }
 0xbcb   : > { %v3276_v36 = vpop.f32.mrb[39].mxu0  ;;  %v3477_v35 = vld [vmem:[#allocation11 + $0x4c] ss:$16 sps:$4 sm:$0xff]  }
 0xbcc   : > { %v3472_v36 = vld [vmem:[#allocation11 + $0x40] ss:$16 sps:$4 sm:$0xff]  }
 0xbdb   : > { %1870 = vrot.lane.b32.xlu1 %v4323_v19, %s3912_s22 }
 0xc10   : > { %v1812_v42 = vpop.xlane.xlu0 %1811 }
 0xc57   : > { %v1803_v37 = vpop.xlane.xlu1 %1802 }
 0xc58   : > { %v1805_v38 = vsub.f32 %v1792_v20, %v1803_v37  ;;  %v3475_v37 = vld [vmem:[#allocation11 + $0x48] ss:$16 sps:$4 sm:$0xff]  }
 0xc5a   : > { %v1808_v39 = vmul.f32 1.442695, %v1805_v38  ;;  %v3480_v38 = vld [vmem:[#allocation11 + $0x64] ss:$16 sps:$4 sm:$0xff]  }
 0xc5b   : > { %v1871_v40 = vpop.permute.xlu1 %1870 }
 0xc5c   : > { %3570 = vpow2.f32 %v1808_v39  ;;  %v1876_v28 = vsel %vm977_vm2, %v1871_v40, 0  ;;  %v3483_v39 = vld [vmem:[#allocation11 + $0x6c] ss:$16 sps:$4 sm:$0xff]   ;;  %v3478_v40 = vld [vmem:[#allocation11 + $0x60] ss:$16 sps:$4 sm:$0xff]  }
 0xc5d   : > { %3284 = vmatpush3.bf16.msra.mxu0 %v1876_v28  ;;  %3572 = vrcp.f32 %v1812_v42  ;;  %v3481_v28 = vld [vmem:[#allocation11 + $0x68] ss:$16 sps:$4 sm:$0xff]   ;;  %v3484_v42 = vld [vmem:[#allocation11 + $0x80] ss:$16 sps:$4 sm:$0xff]  }
 0xc5e   : > { %2247 = vmatprep.subr.bf16.mxu0 %v3462_v15  ;;  %v3510_v15 = vld [vmem:[#allocation13] sm:$0xff]  }
 0xc66   : > { %v3571_v31 = vpop.eup %3570 }
 0xc67   : > { %v1813_v41 = vsel %vm949_vm3, %v3571_v31, 0.0  ;;  %v3573_v43 = vpop.eup %3572 }
 0xc68   : > { %1814 = vadd.xlane.f32.xlu0 %v1813_v41  ;;  %v1818_v19 = vmul.f32 %v3573_v43, %v3569_v24  ;;  %v3466_v24 = vld [vmem:[#allocation11 + $0x20] ss:$16 sps:$4 sm:$0xff]   ;;  %v3489_v41 = vld [vmem:[#allocation11 + $0x8c] ss:$16 sps:$4 sm:$0xff]   ;;  %v3487_v43 = vld [vmem:[#allocation11 + $0x88] ss:$16 sps:$4 sm:$0xff]  }
 0xc6a   : > { %v1820_v47 = vpack.c.bf16 %v1818_v19, %v1818_v19  ;;  %v3495_v19 = vld [vmem:[#allocation11 + $0xac] ss:$16 sps:$4 sm:$0xff]  }
 0xc7e   : > { %1822 = vrot.lane.b32.xlu0 %v4318_v16, %s3912_s22 }
 0xcf5   : > { %v1815_v44 = vpop.xlane.xlu0 %1814 }
 0xcf6   : > { %3574 = vrcp.f32 %v1815_v44  ;;  %v3492_v44 = vld [vmem:[#allocation11 + $0xa4] ss:$16 sps:$4 sm:$0xff]  }
 0xcf9   : > { %v1823_v45 = vpop.permute.xlu0 %1822 }
 0xcfa   : > { %v1828_v46 = vsel %vm977_vm2, %v1823_v45, 0  ;;  %v3490_v45 = vld [vmem:[#allocation11 + $0xa0] ss:$16 sps:$4 sm:$0xff]  }
 0xcfb   : > { %3278 = vmatpush3.bf16.msra.mxu1 %v1828_v46  ;;  %v3493_v46 = vld [vmem:[#allocation11 + $0xa8] ss:$16 sps:$4 sm:$0xff]  }
 0xcfc   : > { %3289 = vmatprep.subr.bf16.mxu1 %v3907_v4 }
 0xcfe   : > { %3280 = vmatmul.mubr.msk.bf16.vlgmr.msra.gmra.mrb[36].mxu1 %vm949_vm3, %v1820_v47  ;;  %v3496_v47 = vld [vmem:[#allocation11 + $0xc0] ss:$16 sps:$4 sm:$0xff]  }
 0xcff   : > { %3293 = vmatprep.mubr.msk.bf16.mxu1 %vm3909_vm0, %v3907_v4  ;;  %3290 = vmatpush3.bf16.msra.mxu1 %v3458_v50  ;;  %v3504_v50 = vld [vmem:[#allocation11 + $0xe4] ss:$16 sps:$4 sm:$0xff]  }
 0xd00   : > { %v3575_v48 = vpop.eup %3574  ;;  %3291 = vmatprep.subr.bf16.mxu1 %v3907_v4 }
 0xd01   : > { %v1819_v16 = vmul.f32 %v3575_v48, %v3571_v31  ;;  %v3486_v31 = vld [vmem:[#allocation11 + $0x84] ss:$16 sps:$4 sm:$0xff]  }
 0xd02   : > { %v3498_v48 = vld [vmem:[#allocation11 + $0xc4] ss:$16 sps:$4 sm:$0xff]  }
 0xd03   : > { %v1821_v49 = vpack.c.bf16 %v1819_v16, %v1819_v16  ;;  %3292 = vmatpush3.bf16.msra.mxu1 %v3459_v51  ;;  %v3499_v16 = vld [vmem:[#allocation11 + $0xc8] ss:$16 sps:$4 sm:$0xff]   ;;  %v3507_v51 = vld [vmem:[#allocation11 + $0xec] ss:$16 sps:$4 sm:$0xff]  }
 0xd04   : > { %2290 = vmatprep.subr.bf16.mxu1 %v3465_v21  ;;  %v3512_v21 = vld [vmem:[#allocation13 + $0x48] sm:$0xff]  }
 0xd05   : > { %3286 = vmatmul.mubr.msk.bf16.vlgmr.msra.gmra.mrb[40].mxu0 %vm949_vm3, %v1821_v49  ;;  %v3501_v49 = vld [vmem:[#allocation11 + $0xcc] ss:$16 sps:$4 sm:$0xff]  }
 0xd06   : > { %2279 = vmatprep.mubr.bf16.mxu0 %v3908_v30 }
 0xdd1   : > { %v1864_v52 = vpop.f32.mrb[36].mxu1 }
 0xdd2   : > { %v3281_v53 = vpop.f32.mrb[37].mxu1 }
 0xdd3   : > { %v1867_v56 = vpop.f32.mrb[38].mxu1  ;;  %v3505_v53 = vld [vmem:[#allocation11 + $0xe8] ss:$16 sps:$4 sm:$0xff]  }
 0xdd4   : > { %v3282_v58 = vpop.f32.mrb[39].mxu1 }
 0xdd8   : > { %v1912_v60 = vpop.f32.mrb[40].mxu0 }
 0xdd9   : > { %v1918_v18 = vpack.c.bf16 %v1912_v60, %v1864_v52  ;;  %v3287_v61 = vpop.f32.mrb[41].mxu0  ;;  %v3502_v52 = vld [vmem:[#allocation11 + $0xe0] ss:$16 sps:$4 sm:$0xff]  }
 0xdda   : > { %v1915_v62 = vpop.f32.mrb[42].mxu0 }
 0xddb   : > { %v3288_v63 = vpop.f32.mrb[43].mxu0  ;;  %3294 = vmatmul.mubr.msk.bf16.vlgmr.msra.gmra.mrb[40].mxu1 %vm856_vm1, %v1918_v18 }
 0xddc   : > { %2322 = vmatprep.mubr.bf16.mxu1 %v3908_v30  ;;  %v3460_v30 = vld [vmem:[#allocation11] ss:$16 sps:$4 sm:$0xff]   ;;  %2291 = vmatpush1.bf16.msra.mxu1 %v3463_v17 }
 0xddd   : > { %2248 = vmatpush1.bf16.msra.mxu0 %v3460_v30  ;;  %2292 = vmatprep.subr.bf16.mxu1 %v3471_v23  ;;  %v3509_v30 = vld [vmem:[#allocation13 + $0xc0] sm:$0xff]   ;;  %v3514_v23 = vld [vmem:[#allocation13 + $0x8] sm:$0xff]  }
 0xdde   : > { %2249 = vmatprep.subr.bf16.mxu0 %v3468_v22  ;;  %v3511_v17 = vld [vmem:[#allocation13 + $0x80] sm:$0xff]   ;;  %v3513_v22 = vld [vmem:[#allocation13 + $0xc8] sm:$0xff]  }
 0xde0   : > { %2293 = vmatpush1.bf16.msra.mxu1 %v3469_v25  ;;  %v3516_v25 = vld [vmem:[#allocation13 + $0x50] sm:$0xff]  }
 0xde1   : > { %2250 = vmatpush1.bf16.msra.mxu0 %v3466_v24  ;;  %2294 = vmatprep.subr.bf16.mxu1 %v3477_v35  ;;  %v3515_v24 = vld [vmem:[#allocation13 + $0x88] sm:$0xff]   ;;  %v3526_v35 = vld [vmem:[#allocation13 + $0x20] sm:$0xff]  }
 0xde2   : > { %2251 = vmatprep.subr.bf16.mxu0 %v3474_v34  ;;  %v3525_v34 = vld [vmem:[#allocation13 + $0xe0] sm:$0xff]  }
 0xde4   : > { %2295 = vmatpush1.bf16.msra.mxu1 %v3475_v37  ;;  %v3528_v37 = vld [vmem:[#allocation13 + $0x68] sm:$0xff]  }
 0xde5   : > { %2252 = vmatpush1.bf16.msra.mxu0 %v3472_v36  ;;  %2296 = vmatprep.subr.bf16.mxu1 %v3483_v39  ;;  %v3527_v36 = vld [vmem:[#allocation13 + $0xa0] sm:$0xff]   ;;  %v3530_v39 = vld [vmem:[#allocation13 + $0x28] sm:$0xff]  }
 0xde6   : > { %2253 = vmatprep.subr.bf16.mxu0 %v3480_v38  ;;  %v3529_v38 = vld [vmem:[#allocation13 + $0xe8] sm:$0xff]  }
 0xde8   : > { %2297 = vmatpush1.bf16.msra.mxu1 %v3481_v28  ;;  %v3532_v28 = vld [vmem:[#allocation13 + $0x70] sm:$0xff]  }
 0xde9   : > { %2254 = vmatpush1.bf16.msra.mxu0 %v3478_v40  ;;  %2298 = vmatprep.subr.bf16.mxu1 %v3489_v41  ;;  %v3531_v40 = vld [vmem:[#allocation13 + $0xa8] sm:$0xff]   ;;  %v3534_v41 = vld [vmem:[#allocation13 + $0x30] sm:$0xff]  }
 0xdea   : > { %2255 = vmatprep.subr.bf16.mxu0 %v3486_v31  ;;  %v3533_v31 = vld [vmem:[#allocation13 + $0xf0] sm:$0xff]  }
 0xdec   : > { %2299 = vmatpush1.bf16.msra.mxu1 %v3487_v43  ;;  %v3536_v43 = vld [vmem:[#allocation13 + $0x78] sm:$0xff]  }
 0xded   : > { %2256 = vmatpush1.bf16.msra.mxu0 %v3484_v42  ;;  %2300 = vmatprep.subr.bf16.mxu1 %v3495_v19  ;;  %v3535_v42 = vld [vmem:[#allocation13 + $0xb0] sm:$0xff]   ;;  %v3538_v19 = vld [vmem:[#allocation13 + $0x38] sm:$0xff]  }
 0xdee   : > { %2257 = vmatprep.subr.bf16.mxu0 %v3492_v44  ;;  %v3537_v44 = vld [vmem:[#allocation13 + $0xf8] sm:$0xff]  }
 0xdf0   : > { %2301 = vmatpush1.bf16.msra.mxu1 %v3493_v46  ;;  %v2065_v46 = vld [vmem:[%s4647_s29] sm:$0xf]  ;;  %s3818_s29 = scalar_lea.vmem %s3817_s24, 512 }
 0xdf1   : > { %2258 = vmatpush1.bf16.msra.mxu0 %v3490_v45  ;;  %2302 = vmatprep.subr.bf16.mxu1 %v3501_v49  ;;  %v3539_v45 = vld [vmem:[#allocation13 + $0xb8] sm:$0xff]   ;;  %v2074_v49 = vrot.slane %v2065_v46, %v629_v55  ;;  %p3820_p3 = scmp.lt.s32.totalorder %s3818_s29, %s3812_s15 }
 0xdf2   : > { %2259 = vmatprep.subr.bf16.mxu0 %v3498_v48  ;;  %v2070_v48 = vrot.slane %v2065_v46, %v625_v59 }
 0xdf3   : > { %p3821_p2 = por %p3820_p3, %p3819_p1 }
 0xdf4   : > { %2303 = vmatpush1.bf16.msra.mxu1 %v3499_v16  ;;  %v2078_v16 = vrot.slane %v2065_v46, %v633_v57 }
 0xdf5   : > { %2260 = vmatpush1.bf16.msra.mxu0 %v3496_v47  ;;  %2304 = vmatprep.subr.bf16.mxu1 %v3507_v51  ;;  %v2081_v47 = vsub.s32 3, %v4295_v54  ;;  %p3822_p8 = pnand %p3821_p2, %p3815_p13 }
 0xdf6   : > { %2261 = vmatprep.subr.bf16.mxu0 %v3504_v50 }
 0xdf7   : > { %v2082_v50 = vrot.slane %v2065_v46, %v2081_v47 }
 0xdf8   : > { %2305 = vmatpush1.bf16.msra.mxu1 %v3505_v53 }
 0xdf9   : > { %2262 = vmatpush1.bf16.msra.mxu0 %v3502_v52  ;;  %3127 = vmatprep.subr.bf16.mxu1 %v3509_v30 }
 0xeae   : > { %v1972_v0 = vpop.f32.mrb[40].mxu1 }
 0xeaf   : > { %v1979_v1 = vadd.f32 %v1972_v0, %v1696_v27  ;;  %v3295_v4 = vpop.f32.mrb[41].mxu1  ;;  %v2970_v0 = vld [vmem:[%s4645_s17] ss:$0 sm:$0xff] }
 0xeb0   : > { %v1975_v2 = vpop.f32.mrb[42].mxu1 }
 0xeb1   : > { %v1981_v6 = vadd.f32 %v3612_v5, %v1979_v1  ;;  %v1980_v7 = vadd.f32 %v1975_v2, %v1697_v11  ;;  %v3296_v9 = vpop.f32.mrb[43].mxu1  ;;  %v2971_v5 = vld [vmem:[%s4646_s30] ss:$0 sm:$0xff]  ;;  %s4557_s30 = scalar_lea.hbm %s4649_s13, %s3051_s20 }
 0xeb3   : > { %v1982_v12 = vadd.f32 %v3613_v10, %v1980_v7  ;;  %v4495_v13 = vadd.f32 %v2969_v3, %v1981_v6 }
 0xeb5   : > { %1994 = vadd.xlane.f32.xlu1 %v4495_v13  ;;  %v4498_v14 = vadd.f32 %v2969_v3, %v1982_v12  ;;  %v3508_v12 = vld [vmem:[#allocation13 + $0x40] sm:$0xff]  }
 0xeb6   : > { %3105 = vmatprep.subr.bf16.mxu0 %v3508_v12 }
 0xeb7   : > { %1996 = vadd.xlane.f32.xlu0 %v4498_v14 }
 0xf42   : > { %v1995_v26 = vpop.xlane.xlu1 %1994 }
 0xf43   : > { %v1998_v27 = vmul.f32 0.0078125, %v1995_v26  ;;  %v3517_v26 = vld [vmem:[#allocation13 + $0xd0] sm:$0xff]  }
 0xf44   : > { %v1997_v8 = vpop.xlane.xlu0 %1996 }
 0xf45   : > { %v4502_v29 = vsub.f32 %v4495_v13, %v1998_v27  ;;  %v1999_v11 = vmul.f32 0.0078125, %v1997_v8  ;;  %v3518_v27 = vld [vmem:[#allocation13 + $0x10] sm:$0xff]  }
 0xf46   : > { %v3519_v8 = vld [vmem:[#allocation13 + $0x90] sm:$0xff]  }
 0xf47   : > { %v4505_v32 = vsub.f32 %v4498_v14, %v1999_v11  ;;  %v2002_v20 = vmul.f32 %v4502_v29, %v4502_v29  ;;  %v3521_v11 = vld [vmem:[#allocation13 + $0xd8] sm:$0xff]  }
 0xf49   : > { %2004 = vadd.xlane.f32.xlu0 %v2002_v20  ;;  %v2003_v33 = vmul.f32 %v4505_v32, %v4505_v32  ;;  %v3523_v20 = vld [vmem:[#allocation13 + $0x98] sm:$0xff]  }
 0xf4b   : > { %2006 = vadd.xlane.f32.xlu1 %v2003_v33  ;;  %v3524_v33 = vld [vmem:[#allocation13 + $0x60] sm:$0xff]  }
 0xfd6   : > { %v2005_v56 = vpop.xlane.xlu0 %2004 }
 0xfd7   : > { %v2008_v58 = vmul.f32 0.0078125, %v2005_v56 }
 0xfd8   : > { %v2007_v60 = vpop.xlane.xlu1 %2006 }
 0xfd9   : > { %v2010_v18 = vadd.f32 1e-05, %v2008_v58  ;;  %v2009_v61 = vmul.f32 0.0078125, %v2007_v60 }
 0xfdb   : > { %3576 = vrsqrt.f32 %v2010_v18  ;;  %v2011_v62 = vadd.f32 1e-05, %v2009_v61 }
 0xfdd   : > { %3578 = vrsqrt.f32 %v2011_v62 }
 0xfe5   : > { %v3577_v63 = vpop.eup %3576 }
 0xfe6   : > { %v2014_v1 = vmul.f32 %v3577_v63, %v4502_v29  ;;  %v3520_v29 = vld [vmem:[#allocation13 + $0x58] sm:$0xff]  }
 0xfe7   : > { %v3579_v4 = vpop.eup %3578 }
 0xfe8   : > { %v2015_v2 = vmul.f32 %v3579_v4, %v4505_v32  ;;  %v2022_v3 = vmul.f32 %v2970_v0, %v2014_v1  ;;  %v3522_v32 = vld [vmem:[#allocation13 + $0x18] sm:$0xff]  }
 0xfea   : > { %v2023_v6 = vmul.f32 %v2970_v0, %v2015_v2  ;;  %v2030_v7 = vadd.f32 %v2971_v5, %v2022_v3 }
 0xfec   : > { %v2031_v9 = vadd.f32 %v2971_v5, %v2023_v6 }
 0xfee   : > { %v2032_v10 = vpack.c.bf16 %v2031_v9, %v2030_v7 }
 0xff0   : > { %2280 = vmatmul.mubr.bf16.vlgmr.msra.gmra.mrb[44].mxu0 %v2032_v10  ;;  %2323 = vmatmul.mubr.bf16.vlgmr.msra.gmra.mrb[44].mxu1 %v2032_v10 }
 0xff1   : > { %3106 = vmatpush3.bf16.msra.mxu0 %v3510_v15  ;;  %3128 = vmatpush3.bf16.msra.mxu1 %v3511_v17 }
 0xff2   : > { %3107 = vmatprep.subr.bf16.mxu0 %v3512_v21  ;;  %3129 = vmatprep.subr.bf16.mxu1 %v3513_v22 }
 0xff5   : > { %3108 = vmatpush3.bf16.msra.mxu0 %v3514_v23  ;;  %3130 = vmatpush3.bf16.msra.mxu1 %v3515_v24 }
 0xff6   : > { %3109 = vmatprep.subr.bf16.mxu0 %v3516_v25  ;;  %3131 = vmatprep.subr.bf16.mxu1 %v3517_v26 }
 0xff9   : > { %3110 = vmatpush3.bf16.msra.mxu0 %v3518_v27  ;;  %3132 = vmatpush3.bf16.msra.mxu1 %v3519_v8 }
 0xffa   : > { %3111 = vmatprep.subr.bf16.mxu0 %v3520_v29  ;;  %3133 = vmatprep.subr.bf16.mxu1 %v3521_v11 }
 0xffd   : > { %3112 = vmatpush3.bf16.msra.mxu0 %v3522_v32  ;;  %3134 = vmatpush3.bf16.msra.mxu1 %v3523_v20 }
 0xffe   : > { %3113 = vmatprep.subr.bf16.mxu0 %v3524_v33  ;;  %3135 = vmatprep.subr.bf16.mxu1 %v3525_v34 }
0x1001   : > { %3114 = vmatpush3.bf16.msra.mxu0 %v3526_v35  ;;  %3136 = vmatpush3.bf16.msra.mxu1 %v3527_v36 }
0x1002   : > { %3115 = vmatprep.subr.bf16.mxu0 %v3528_v37  ;;  %3137 = vmatprep.subr.bf16.mxu1 %v3529_v38 }
0x1005   : > { %3116 = vmatpush3.bf16.msra.mxu0 %v3530_v39  ;;  %3138 = vmatpush3.bf16.msra.mxu1 %v3531_v40 }
0x1006   : > { %3117 = vmatprep.subr.bf16.mxu0 %v3532_v28  ;;  %3139 = vmatprep.subr.bf16.mxu1 %v3533_v31 }
0x1009   : > { %3118 = vmatpush3.bf16.msra.mxu0 %v3534_v41  ;;  %3140 = vmatpush3.bf16.msra.mxu1 %v3535_v42 }
0x100a   : > { %3119 = vmatprep.subr.bf16.mxu0 %v3536_v43  ;;  %3141 = vmatprep.subr.bf16.mxu1 %v3537_v44 }
0x100d   : > { %3120 = vmatpush3.bf16.msra.mxu0 %v3538_v19  ;;  %3142 = vmatpush3.bf16.msra.mxu1 %v3539_v45 }
0x10c3   : > { %v2281_v51 = vpop.f32.mrb[44].mxu0  ;;  %v2324_v52 = vpop.f32.mrb[44].mxu1 }
0x10c4   : > { %v4529_v53 = vadd.f32 %v2281_v51, %v2070_v48  ;;  %v4531_v56 = vadd.f32 %v2324_v52, %v2078_v16  ;;  %v2283_v58 = vpop.f32.mrb[45].mxu0  ;;  %v2326_v60 = vpop.f32.mrb[45].mxu1 }
0x10c5   : > { %v4533_v18 = vadd.f32 %v2283_v58, %v2074_v49  ;;  %v4535_v61 = vadd.f32 %v2326_v60, %v2082_v50  ;;  %v2285_v59 = vpop.f32.mrb[46].mxu0  ;;  %v2328_v62 = vpop.f32.mrb[46].mxu1 }
0x10c6   : > { %v3004_v57 = vmul.f32 -1.702, %v4529_v53  ;;  %v3006_v54 = vmul.f32 -1.702, %v4531_v56  ;;  %v2286_v55 = vadd.f32 %v2285_v59, %v2070_v48  ;;  %v2329_v63 = vadd.f32 %v2328_v62, %v2078_v16  ;;  %v2287_v0 = vpop.f32.mrb[47].mxu0  ;;  %v2330_v1 = vpop.f32.mrb[47].mxu1 }
0x10c7   : > { %v3005_v4 = vmul.f32 -1.702, %v4533_v18  ;;  %v3007_v2 = vmul.f32 -1.702, %v4535_v61  ;;  %v2288_v3 = vadd.f32 %v2287_v0, %v2074_v49  ;;  %v2331_v5 = vadd.f32 %v2330_v1, %v2082_v50 }
0x10c8   : > { %v2349_v6 = vmul.f32 1.442695, %v3004_v57  ;;  %v2353_v7 = vmul.f32 1.442695, %v3006_v54  ;;  %v3008_v9 = vmul.f32 -1.702, %v2286_v55 }
0x10c9   : > { %v2351_v10 = vmul.f32 1.442695, %v3005_v4  ;;  %v2355_v12 = vmul.f32 1.442695, %v3007_v2  ;;  %v3010_v30 = vmul.f32 -1.702, %v2329_v63 }
0x10ca   : > { %3580 = vpow2.f32 %v2349_v6  ;;  %v2357_v15 = vmul.f32 1.442695, %v3008_v9  ;;  %v3009_v17 = vmul.f32 -1.702, %v2288_v3  ;;  %v3011_v21 = vmul.f32 -1.702, %v2331_v5 }
0x10cb   : > { %3582 = vpow2.f32 %v2353_v7  ;;  %v2361_v22 = vmul.f32 1.442695, %v3010_v30 }
0x10cc   : > { %3584 = vpow2.f32 %v2351_v10  ;;  %v2359_v23 = vmul.f32 1.442695, %v3009_v17  ;;  %v2363_v24 = vmul.f32 1.442695, %v3011_v21 }
0x10cd   : > { %3586 = vpow2.f32 %v2355_v12 }
0x10ce   : > { %3588 = vpow2.f32 %v2357_v15 }
0x10cf   : > { %3590 = vpow2.f32 %v2361_v22 }
0x10d0   : > { %3592 = vpow2.f32 %v2359_v23 }
0x10d1   : > { %3594 = vpow2.f32 %v2363_v24 }
0x10d4   : > { %v3581_v25 = vpop.eup %3580 }
0x10d5   : > { %v3583_v26 = vpop.eup %3582  ;;  %v2365_v27 = vadd.f32 1.0, %v3581_v25 }
0x10d6   : > { %v3585_v8 = vpop.eup %3584  ;;  %v2367_v29 = vadd.f32 1.0, %v3583_v26 }
0x10d7   : > { %v3587_v11 = vpop.eup %3586  ;;  %3596 = vrcp.f32 %v2365_v27  ;;  %v2366_v32 = vadd.f32 1.0, %v3585_v8 }
0x10d8   : > { %v3589_v20 = vpop.eup %3588  ;;  %3598 = vrcp.f32 %v2367_v29  ;;  %v2368_v33 = vadd.f32 1.0, %v3587_v11 }
0x10d9   : > { %v3591_v34 = vpop.eup %3590  ;;  %3600 = vrcp.f32 %v2366_v32  ;;  %v2369_v35 = vadd.f32 1.0, %v3589_v20 }
0x10da   : > { %v3593_v36 = vpop.eup %3592  ;;  %3602 = vrcp.f32 %v2368_v33  ;;  %v2371_v37 = vadd.f32 1.0, %v3591_v34 }
0x10db   : > { %v3595_v38 = vpop.eup %3594  ;;  %3604 = vrcp.f32 %v2369_v35  ;;  %v2370_v39 = vadd.f32 1.0, %v3593_v36 }
0x10dc   : > { %3606 = vrcp.f32 %v2371_v37  ;;  %v2372_v40 = vadd.f32 1.0, %v3595_v38 }
0x10dd   : > { %3608 = vrcp.f32 %v2370_v39 }
0x10de   : > { %3610 = vrcp.f32 %v2372_v40 }
0x10e1   : > { %v3597_v28 = vpop.eup %3596 }
0x10e2   : > { %v3599_v31 = vpop.eup %3598  ;;  %v2389_v19 = vmul.f32 %v3597_v28, %v4529_v53 }
0x10e3   : > { %v3601_v41 = vpop.eup %3600  ;;  %v2391_v47 = vmul.f32 %v3599_v31, %v4531_v56  ;;  %v3012_v56 = vld [vmem:[%s4648_s16] ss:$0 sm:$0xff] }
0x10e4   : > { %v3603_v42 = vpop.eup %3602  ;;  %v2390_v49 = vmul.f32 %v3601_v41, %v4533_v18 }
0x10e5   : > { %v3605_v43 = vpop.eup %3604  ;;  %v2392_v52 = vmul.f32 %v3603_v42, %v4535_v61 }
0x10e6   : > { %v3607_v44 = vpop.eup %3606  ;;  %v2393_v45 = vmul.f32 %v3605_v43, %v2286_v55 }
0x10e7   : > { %v3609_v46 = vpop.eup %3608  ;;  %v2395_v48 = vmul.f32 %v3607_v44, %v2329_v63 }
0x10e8   : > { %v3611_v16 = vpop.eup %3610  ;;  %v2397_v50 = vpack.c.bf16 %v2393_v45, %v2389_v19  ;;  %v2394_v51 = vmul.f32 %v3609_v46, %v2288_v3 }
0x10e9   : > { %v2399_v58 = vpack.c.bf16 %v2395_v48, %v2391_v47  ;;  %v2396_v60 = vmul.f32 %v3611_v16, %v2331_v5 }
0x10ea   : > { %v2398_v59 = vpack.c.bf16 %v2394_v51, %v2390_v49 }
0x10eb   : > { %v2400_v62 = vpack.c.bf16 %v2396_v60, %v2392_v52 }
0x10ec   : > { %2696 = vmatprep.mubr.bf16.mxu0 %v2398_v59 }
0x10ed   : > { %2737 = vmatprep.mubr.bf16.mxu1 %v2400_v62  ;;  %2697 = vmatmul.mubr.bf16.vlgmr.msra.gmra.mrb[48].mxu0 %v2397_v50 }
0x10ee   : > { %2738 = vmatmul.mubr.bf16.vlgmr.msra.gmra.mrb[48].mxu1 %v2399_v58 }
0x11c0   : > { %v3121_v53 = vpop.f32.mrb[48].mxu0 }
0x11c1   : > { %v3143_v57 = vpop.f32.mrb[48].mxu1  ;;  %v3122_v18 = vpop.f32.mrb[49].mxu0 }
0x11c2   : > { %v3123_v54 = vadd.f32 %v3122_v18, %v3121_v53  ;;  %v3144_v55 = vpop.f32.mrb[49].mxu1  ;;  %v3124_v61 = vpop.f32.mrb[50].mxu0 }
0x11c3   : > { %v3145_v63 = vadd.f32 %v3144_v55, %v3143_v57  ;;  %v3146_v0 = vpop.f32.mrb[50].mxu1  ;;  %v3125_v1 = vpop.f32.mrb[51].mxu0 }
0x11c4   : > { %v2699_v4 = vadd.f32 %v3123_v54, %v3012_v56  ;;  %v3126_v2 = vadd.f32 %v3125_v1, %v3124_v61  ;;  %v3147_v3 = vpop.f32.mrb[51].mxu1 }
0x11c5   : > { %v3148_v5 = vadd.f32 %v3147_v3, %v3146_v0 }
0x11c6   : > { %v2740_v6 = vadd.f32 %v3145_v63, %v2699_v4  ;;  %v2702_v7 = vadd.f32 %v3126_v2, %v3012_v56 }
0x11c8   : > { %v2746_v9 = vadd.f32 %v2740_v6, %v4495_v13  ;;  %v2743_v10 = vadd.f32 %v3148_v5, %v2702_v7 }
0x11ca   : > { %2748 = vst [vmem:[%s541_s23] sm:$0xff] %v2746_v9  ;;  %v2747_v12 = vadd.f32 %v2743_v10, %v4498_v14 }
0x11cc   : > { %2749 = vst [vmem:[%s541_s23 + $0x8] sm:$0xff] %v2747_v12 }
0x11cd   : > { %3825 = shalt.err (!%p3822_p8)
}
0x11ce   : > { %s3826_s21 = scalar_lea.hbm %s4557_s30, 256  ;;  %s3830_s23 = scalar_lea.hbm %s4649_s13, 512 }
0x11cf   : > { %p3827_p10 = scmp.ne.s32.totalorder %s4557_s30, %s3826_s21  ;;  %p3831_p0 = scmp.lt.u32.totalorder %s4557_s30, %s4649_s13 }
0x11d0   : > { %p3832_p5 = scmp.lt.u32.totalorder %s3830_s23, %s3826_s21  ;;  %p3834_p6 = scmp.lt.u32.totalorder %s3826_s21, %s4557_s30 }
0x11d1   : > { %p3828_p11 = pnand %p3827_p10, %p4650_p9 }
0x11d2   : > { %p3833_p7 = por %p3832_p5, %p3831_p0 }
0x11d3   : > { %p3829_p12 = pneg %p3828_p11 }
0x11d4   : > { %p3835_p4 = por %p3834_p6, %p3833_p7 }
0x11d6   : > { %p3836_p13 = pnand %p3835_p4, %p3829_p12 }
0x11d8   : > { %3839 = shalt.err (!%p3836_p13)
}
0x11d9   : > { %s3914_s8 = smov 128   ;;  %s3915_s15 = smov 8  }
0x11da   : > { %3323 = dma.vmem_to_hbm [thread:$0]  (%p4650_p9), %s4552_s19, 256, %s4557_s30, %s2751_s12, %s3914_s8, %s3914_s8, %s3915_s15  }
0x11db PF: > { %s2779_s14 = sand.u32 1, %s3878_s25   ;;  %p4651_p1 = scmp.ne.s32.totalorder %s4636_s7, 0 }
0x11dc   : > { %p4652_p3 = scmp.ge.s32.totalorder %s3890_s28, 2  ;;  %s2780_s24 = scalar_lea.sflag [#allocation4], %s2779_s14 }
0x11de   : > { %p3349_p2 = pnand %p4652_p3, %p4651_p1 }
0x11e0   : > { %3873 = dma.done.wait (!%p3349_p2), %s2780_s24, 256  }
0x11e1   : > { %3875 = vsyncadd (!%p3349_p2), %s2780_s24, 4294967040  ;;  %p29_p8 = scmp.ge.s32.totalorder %s4163_s18, 4   ;;  %s4653_s25 = smov %s3882_s26 }
0x11e2   : > { %s4654_s26 = smov %s3886_s27  ;;  %s4655_s27 = smov %s4174_s10 }
0x11e3   : > { %s4656_s28 = smov %s4163_s18  ;;  %31 = sbr.rel (!%p29_p8) target bundleno = 16 (0x10), region = 141 }
0x11ea   :  { %2785 = vsyncpa [#allocation3], 1 }
0x11eb   :  { %2787 = vsyncpa [#allocation3 + $0x1], 1 }
0x11ec   :  { %2788 = vsyncpa [#allocation6], 1 }
0x11ed   :  { %2789 = vsyncpa [#allocation9], 1 }
0x11ee   :  { %2790 = vsyncpa [#allocation12], 1 }
0x11ef   :  { %2791 = vsyncpa [#allocation4], 1 }
0x11f0   :  { %2793 = vsyncpa [#allocation4 + $0x1], 1 }

</bundles_post_ra>
